<compile_context>
chip_gen: v7x
topology: tpu7x:2x2x1
jax: 0.10.0
libtpu: 0.0.40
codegen_flags: <defaults>
</compile_context>

<pallas_src>
import math
import jax
import jax.numpy as jnp
from jax.experimental import pallas as pl
from jax.experimental.pallas import tpu as pltpu

# Scaled-down covid-twitter-bert-v2 (BERT-large) config for a small runnable synthetic kernel.
HIDDEN = 32          # real: 1024
NUM_HEADS = 2        # real: 16
HEAD_DIM = HIDDEN // NUM_HEADS
INTERMEDIATE = 64    # real: 4096
NUM_LAYERS = 2       # real: 24
VOCAB = 64           # real: 30522
MAX_POS = 16         # real: 512
TYPE_VOCAB = 2
N_CLASSES = 3
CLS_PAD = 128        # classifier output padded to one full 128-lane register (lane-dense store)

TOTAL_BATCH = 4      # total batch
BATCH_TILE = 2       # batch rows per grid step (>= 2 row tiles total -> v7x megacore can shard)
SEQ = 8
ROW_TILE = BATCH_TILE * SEQ   # activation rows per grid step (multiple of SEQ)
LN_EPS = 1e-12

# Scoped VMEM: raised above the 16/32 MB defaults. At real size: ~96-112 MB on v6e (128 MiB
# physical), ~56 MB cap + FFN INTERMEDIATE chunking on v7x (64 MiB physical), >= ~64 MB on v5e.
VMEM_LIMIT_BYTES = 48 * 1024 * 1024

LAYER_PARAM_NAMES = ('wq', 'bq', 'wk', 'bk', 'wv', 'bv', 'wo', 'bo',
                     'ln1_g', 'ln1_b', 'wi', 'bi', 'wp', 'bp', 'ln2_g', 'ln2_b')


# ----------------------------- in-kernel helpers -----------------------------

def _layernorm(x, g, b):
    mu = jnp.mean(x, axis=-1, keepdims=True)
    var = jnp.mean((x - mu) ** 2, axis=-1, keepdims=True)
    return (x - mu) * jax.lax.rsqrt(var + LN_EPS) * g + b


def _gelu(x):
    # TODO(synk): HF BERT uses exact erf-GELU; tanh approximation used for Mosaic-safe lowering.
    return 0.5 * x * (1.0 + jnp.tanh(0.7978845608028654 * (x + 0.044715 * x * x * x)))


# ------------------------------ encoder kernel --------------------------------

def encoder_kernel(emb_ref, mask_ref, emb_g_ref, emb_b_ref,
                   wq_ref, bq_ref, wk_ref, bk_ref, wv_ref, bv_ref,
                   wo_ref, bo_ref, ln1g_ref, ln1b_ref,
                   wi_ref, bi_ref, wp_ref, bp_ref, ln2g_ref, ln2b_ref,
                   cls_out_ref,
                   h_ref, ctx_ref):
    layer = pl.program_id(1)

    # ---- layer 0: embedding LayerNorm; activations stay VMEM-resident across the layer axis ----
    @pl.when(layer == 0)
    def _():
        h_ref[...] = _layernorm(emb_ref[...], emb_g_ref[...], emb_b_ref[...])

    h = h_ref[...]                                  # (ROW_TILE, H) f32
    h_bf = h.astype(jnp.bfloat16)

    # ---- self-attention: full-width QKV projections (bf16 in, f32 accumulate) ----
    q = jnp.dot(h_bf, wq_ref[0], preferred_element_type=jnp.float32) + bq_ref[0]
    k = jnp.dot(h_bf, wk_ref[0], preferred_element_type=jnp.float32) + bk_ref[0]
    v = jnp.dot(h_bf, wv_ref[0], preferred_element_type=jnp.float32) + bv_ref[0]

    # Mask broadcast hoisted out of the head loop (JAX does not CSE broadcast_in_dim).
    mask_b = jnp.broadcast_to(mask_ref[...], (BATCH_TILE, SEQ, SEQ))
    scale = 1.0 / math.sqrt(HEAD_DIM)

    # Per-head scores/softmax/context; each head's context is stored into the (rows, H) bf16 VMEM
    # scratch at its lane offset, then ONE full-K output projection is issued below.
    # TODO(synk): at real size (S=512, 16 heads) fold heads into the matmul batch dim / restructure
    # flash-attention style (query tiles + online softmax) instead of per-head slices and full
    # (B, S, S) scores, and use lax.fori_loop to bound vreg live ranges at 16 heads.
    for hd in range(NUM_HEADS):
        sl = slice(hd * HEAD_DIM, (hd + 1) * HEAD_DIM)
        qh = (q[:, sl] * scale).reshape(BATCH_TILE, SEQ, HEAD_DIM).astype(jnp.bfloat16)
        kh = k[:, sl].reshape(BATCH_TILE, SEQ, HEAD_DIM).astype(jnp.bfloat16)
        vh = v[:, sl].reshape(BATCH_TILE, SEQ, HEAD_DIM).astype(jnp.bfloat16)
        s = jnp.einsum('bqd,bkd->bqk', qh, kh, preferred_element_type=jnp.float32)
        s = s + mask_b
        s = s - jnp.max(s, axis=-1, keepdims=True)               # stable softmax
        e = jnp.exp(s)
        p = e * pl.reciprocal(jnp.sum(e, axis=-1, keepdims=True), approx=True)
        ctx = jnp.einsum('bqk,bkd->bqd', p.astype(jnp.bfloat16), vh,
                         preferred_element_type=jnp.float32)      # (BT, S, dh)
        ctx_ref[:, sl] = ctx.reshape(ROW_TILE, HEAD_DIM).astype(jnp.bfloat16)

    # ---- single full-K output projection: (rows, H) @ (H, H) ----
    attn = jnp.dot(ctx_ref[...], wo_ref[0], preferred_element_type=jnp.float32) + bo_ref[0]
    h1 = _layernorm(attn + h, ln1g_ref[0], ln1b_ref[0])

    # ---- FFN: GELU output cast to bf16 immediately (bf16 intermediate) ----
    # TODO(synk): at real size on v7x (64 MiB VMEM), chunk wi/wp along INTERMEDIATE with a third
    # (reduction) grid axis so double-buffered layer weights + activations fit.
    ff = _gelu(jnp.dot(h1.astype(jnp.bfloat16), wi_ref[0],
                       preferred_element_type=jnp.float32) + bi_ref[0]).astype(jnp.bfloat16)
    ff = jnp.dot(ff, wp_ref[0], preferred_element_type=jnp.float32) + bp_ref[0]
    h2 = _layernorm(ff + h1, ln2g_ref[0], ln2b_ref[0])
    h_ref[...] = h2

    # [CLS] hidden written unconditionally every layer (cheap VMEM store; HBM writeback happens
    # once per row tile when the output block index changes -> no pl.when/revisit fragility).
    cls_out_ref[...] = h2.reshape(BATCH_TILE, SEQ, HIDDEN)[:, 0, :][None]


# -------------------------- pooler + classifier kernel -------------------------

def pooler_classifier_kernel(cls_ref, pw_ref, pb_ref, cw_ref, cb_ref, out_ref):
    pooled = jnp.tanh(jnp.dot(cls_ref[...].astype(jnp.bfloat16), pw_ref[...],
                              preferred_element_type=jnp.float32) + pb_ref[...])
    out_ref[...] = jnp.dot(pooled.astype(jnp.bfloat16), cw_ref[...],
                           preferred_element_type=jnp.float32) + cb_ref[...]


# ------------------------------ pallas wrappers -------------------------------

def _layer_spec(x):
    nd = x.ndim
    return pl.BlockSpec((1,) + x.shape[1:],
                        lambda b, l, _n=nd: (l,) + (0,) * (_n - 1))


def _fixed_spec(shape):
    return pl.BlockSpec(shape, lambda b, l, _n=len(shape): (0,) * _n)


def run_bert(params, emb_flat, add_mask):
    rows = emb_flat.shape[0]
    B = add_mask.shape[0]
    n_row_tiles = rows // ROW_TILE

    in_specs = [
        pl.BlockSpec((ROW_TILE, HIDDEN), lambda b, l: (b, 0)),        # flat (rows, H) activations
        pl.BlockSpec((BATCH_TILE, 1, SEQ), lambda b, l: (b, 0, 0)),   # additive mask
        _fixed_spec(params['emb_ln_g'].shape),
        _fixed_spec(params['emb_ln_b'].shape),
    ]
    layer_args = []
    for name in LAYER_PARAM_NAMES:
        in_specs.append(_layer_spec(params[name]))
        layer_args.append(params[name])

    cls_hidden = pl.pallas_call(
        encoder_kernel,
        out_shape=jax.ShapeDtypeStruct((n_row_tiles, BATCH_TILE, HIDDEN), jnp.float32),
        grid_spec=pltpu.PrefetchScalarGridSpec(
            num_scalar_prefetch=0,
            grid=(n_row_tiles, NUM_LAYERS),
            in_specs=in_specs,
            out_specs=pl.BlockSpec((1, BATCH_TILE, HIDDEN), lambda b, l: (b, 0, 0)),
            scratch_shapes=[pltpu.VMEM((ROW_TILE, HIDDEN), jnp.float32),    # residual stream
                            pltpu.VMEM((ROW_TILE, HIDDEN), jnp.bfloat16)]), # per-head ctx slab
        compiler_params=pltpu.CompilerParams(
            dimension_semantics=("parallel", "arbitrary"),
            vmem_limit_bytes=VMEM_LIMIT_BYTES),
    )(emb_flat, add_mask, params['emb_ln_g'], params['emb_ln_b'], *layer_args)

    cls_hidden = cls_hidden.reshape(B, HIDDEN)

    # Tiny separate call: pooler + replaced seq_relationship head, lane-dense (B, 128) output.
    logits_pad = pl.pallas_call(
        pooler_classifier_kernel,
        out_shape=jax.ShapeDtypeStruct((B, CLS_PAD), jnp.float32),
    )(cls_hidden, params['pooler_w'], params['pooler_b'], params['cls_w'], params['cls_b'])
    return logits_pad[:, :N_CLASSES]


# ------------------------------- model glue ----------------------------------

def init_params(key):
    keys = iter(jax.random.split(key, 64))

    def w(shape, dtype=jnp.bfloat16, scale=0.02):
        return (scale * jax.random.normal(next(keys), shape, jnp.float32)).astype(dtype)

    def zeros(shape):
        return jnp.zeros(shape, jnp.float32)

    def ones(shape):
        return jnp.ones(shape, jnp.float32)

    L = NUM_LAYERS
    cls_w = jnp.zeros((HIDDEN, CLS_PAD), jnp.float32)
    cls_w = cls_w.at[:, :N_CLASSES].set(
        0.02 * jax.random.normal(next(keys), (HIDDEN, N_CLASSES), jnp.float32))
    params = {
        # embedding tables stay f32 (gathers are done in the wrapper)
        'word_emb': w((VOCAB, HIDDEN), jnp.float32),
        'pos_emb': w((MAX_POS, HIDDEN), jnp.float32),
        'type_emb': w((TYPE_VOCAB, HIDDEN), jnp.float32),
        'emb_ln_g': ones((1, HIDDEN)), 'emb_ln_b': zeros((1, HIDDEN)),
        # layer-stacked encoder weights: leading dim = layer, matmul weights in bf16,
        # stored as (in_dim, out_dim) so y = x @ W + b (transpose of nn.Linear.weight)
        'wq': w((L, HIDDEN, HIDDEN)), 'bq': zeros((L, 1, HIDDEN)),
        'wk': w((L, HIDDEN, HIDDEN)), 'bk': zeros((L, 1, HIDDEN)),
        'wv': w((L, HIDDEN, HIDDEN)), 'bv': zeros((L, 1, HIDDEN)),
        'wo': w((L, HIDDEN, HIDDEN)), 'bo': zeros((L, 1, HIDDEN)),
        'ln1_g': ones((L, 1, HIDDEN)), 'ln1_b': zeros((L, 1, HIDDEN)),
        'wi': w((L, HIDDEN, INTERMEDIATE)), 'bi': zeros((L, 1, INTERMEDIATE)),
        'wp': w((L, INTERMEDIATE, HIDDEN)), 'bp': zeros((L, 1, HIDDEN)),
        'ln2_g': ones((L, 1, HIDDEN)), 'ln2_b': zeros((L, 1, HIDDEN)),
        # pooler + replaced seq_relationship head (Linear(1024, n_classes)), lane-padded
        'pooler_w': w((HIDDEN, HIDDEN)), 'pooler_b': zeros((1, HIDDEN)),
        'cls_w': cls_w.astype(jnp.bfloat16), 'cls_b': zeros((1, CLS_PAD)),
    }
    return params


def covid_twitter_bert_classifier(params, input_ids, token_type_ids, input_mask):
    B, S = input_ids.shape
    # Embedding gathers are glue (plain JAX); encoder + pooler/classifier run in Pallas kernels.
    positions = jnp.arange(S)
    emb = (params['word_emb'][input_ids]
           + params['pos_emb'][positions][None, :, :]
           + params['type_emb'][token_type_ids]).astype(jnp.float32)
    emb_flat = emb.reshape(B * S, HIDDEN)                                       # flat rows for tiling
    add_mask = ((1.0 - input_mask.astype(jnp.float32)) * -10000.0)[:, None, :]  # (B, 1, S)
    logits = run_bert(params, emb_flat, add_mask)
    return logits   # == outputs[1] (seq_relationship logits); no sigmoid in forward


if __name__ == "__main__":
    key = jax.random.PRNGKey(0)
    kp, ki = jax.random.split(key, 2)
    params = init_params(kp)

    input_ids = jax.random.randint(ki, (TOTAL_BATCH, SEQ), 0, VOCAB, dtype=jnp.int32)
    token_type_ids = jnp.zeros((TOTAL_BATCH, SEQ), jnp.int32)
    input_mask = jnp.ones((TOTAL_BATCH, SEQ), jnp.int32).at[:, -2:].set(0)  # last two positions padded

    logits = covid_twitter_bert_classifier(params, input_ids, token_type_ids, input_mask)
    jax.block_until_ready(logits)
    assert logits.shape == (TOTAL_BATCH, N_CLASSES)
    assert jnp.all(jnp.isfinite(logits))
    print("KERNEL_OK")
</pallas_src>

<mosaic_0001>
module attributes {stable_mosaic.version = 11 : i64} {
  func.func @encoder_kernel(%arg0: i32, %arg1: i32, %arg2: memref<16x32xf32, #tpu.memory_space<vmem>>, %arg3: memref<2x1x8xf32, #tpu.memory_space<vmem>>, %arg4: memref<1x32xf32, #tpu.memory_space<vmem>>, %arg5: memref<1x32xf32, #tpu.memory_space<vmem>>, %arg6: memref<1x32x32xbf16, #tpu.memory_space<vmem>>, %arg7: memref<1x1x32xf32, #tpu.memory_space<vmem>>, %arg8: memref<1x32x32xbf16, #tpu.memory_space<vmem>>, %arg9: memref<1x1x32xf32, #tpu.memory_space<vmem>>, %arg10: memref<1x32x32xbf16, #tpu.memory_space<vmem>>, %arg11: memref<1x1x32xf32, #tpu.memory_space<vmem>>, %arg12: memref<1x32x32xbf16, #tpu.memory_space<vmem>>, %arg13: memref<1x1x32xf32, #tpu.memory_space<vmem>>, %arg14: memref<1x1x32xf32, #tpu.memory_space<vmem>>, %arg15: memref<1x1x32xf32, #tpu.memory_space<vmem>>, %arg16: memref<1x32x64xbf16, #tpu.memory_space<vmem>>, %arg17: memref<1x1x64xf32, #tpu.memory_space<vmem>>, %arg18: memref<1x64x32xbf16, #tpu.memory_space<vmem>>, %arg19: memref<1x1x32xf32, #tpu.memory_space<vmem>>, %arg20: memref<1x1x32xf32, #tpu.memory_space<vmem>>, %arg21: memref<1x1x32xf32, #tpu.memory_space<vmem>>, %arg22: memref<1x2x32xf32, #tpu.memory_space<vmem>>, %arg23: memref<16x32xf32, #tpu.memory_space<vmem>>, %arg24: memref<16x32xbf16, #tpu.memory_space<vmem>>) attributes {dimension_semantics = [#tpu.dimension_semantics<parallel>, #tpu.dimension_semantics<arbitrary>], iteration_bounds = array<i64: 2, 2>, scalar_prefetch = 0 : i64, scratch_operands = 2 : i64, tpu.core_type = #tpu.core_type<tc>, window_params = [{transform_indices = @transform_0, window_bounds = array<i64: 16, 32>}, {transform_indices = @transform_1, window_bounds = array<i64: 2, 1, 8>}, {pipeline_mode = #tpu.pipeline_mode<synchronous>, transform_indices = @transform_2, window_bounds = array<i64: 1, 32>}, {pipeline_mode = #tpu.pipeline_mode<synchronous>, transform_indices = @transform_3, window_bounds = array<i64: 1, 32>}, {transform_indices = @transform_4, window_bounds = array<i64: 1, 32, 32>}, {transform_indices = @transform_5, window_bounds = array<i64: 1, 1, 32>}, {transform_indices = @transform_6, window_bounds = array<i64: 1, 32, 32>}, {transform_indices = @transform_7, window_bounds = array<i64: 1, 1, 32>}, {transform_indices = @transform_8, window_bounds = array<i64: 1, 32, 32>}, {transform_indices = @transform_9, window_bounds = array<i64: 1, 1, 32>}, {transform_indices = @transform_10, window_bounds = array<i64: 1, 32, 32>}, {transform_indices = @transform_11, window_bounds = array<i64: 1, 1, 32>}, {transform_indices = @transform_12, window_bounds = array<i64: 1, 1, 32>}, {transform_indices = @transform_13, window_bounds = array<i64: 1, 1, 32>}, {transform_indices = @transform_14, window_bounds = array<i64: 1, 32, 64>}, {transform_indices = @transform_15, window_bounds = array<i64: 1, 1, 64>}, {transform_indices = @transform_16, window_bounds = array<i64: 1, 64, 32>}, {transform_indices = @transform_17, window_bounds = array<i64: 1, 1, 32>}, {transform_indices = @transform_18, window_bounds = array<i64: 1, 1, 32>}, {transform_indices = @transform_19, window_bounds = array<i64: 1, 1, 32>}, {transform_indices = @transform_20, window_bounds = array<i64: 1, 2, 32>}]} {
    %c0_i32 = arith.constant 0 : i32
    %0 = arith.cmpi eq, %arg1, %c0_i32 : i32
    %1 = arith.extui %0 : i1 to i32
    %c0_i32_0 = arith.constant 0 : i32
    %2 = arith.cmpi ne, %1, %c0_i32_0 : i32
    scf.if %2 {
      %c0_92 = arith.constant 0 : index
      %c0_93 = arith.constant 0 : index
      %182 = vector.load %arg2[%c0_92, %c0_93] : memref<16x32xf32, #tpu.memory_space<vmem>>, vector<16x32xf32>
      %c0_94 = arith.constant 0 : index
      %c0_95 = arith.constant 0 : index
      %183 = vector.load %arg4[%c0_94, %c0_95] : memref<1x32xf32, #tpu.memory_space<vmem>>, vector<1x32xf32>
      %c0_96 = arith.constant 0 : index
      %c0_97 = arith.constant 0 : index
      %184 = vector.load %arg5[%c0_96, %c0_97] : memref<1x32xf32, #tpu.memory_space<vmem>>, vector<1x32xf32>
      %cst_98 = arith.constant dense<0.000000e+00> : vector<16xf32>
      %185 = vector.multi_reduction <add>, %182, %cst_98 [1] : vector<16x32xf32> to vector<16xf32>
      %186 = vector.shape_cast %185 : vector<16xf32> to vector<16x1xf32>
      %cst_99 = arith.constant 3.200000e+01 : f32
      %187 = vector.broadcast %cst_99 : f32 to vector<16x1xf32>
      %188 = arith.divf %186, %187 : vector<16x1xf32>
      %189 = vector.broadcast %188 : vector<16x1xf32> to vector<16x32xf32>
      %190 = arith.subf %182, %189 : vector<16x32xf32>
      %191 = arith.mulf %190, %190 : vector<16x32xf32>
      %cst_100 = arith.constant dense<0.000000e+00> : vector<16xf32>
      %192 = vector.multi_reduction <add>, %191, %cst_100 [1] : vector<16x32xf32> to vector<16xf32>
      %193 = vector.shape_cast %192 : vector<16xf32> to vector<16x1xf32>
      %cst_101 = arith.constant 3.200000e+01 : f32
      %194 = vector.broadcast %cst_101 : f32 to vector<16x1xf32>
      %195 = arith.divf %193, %194 : vector<16x1xf32>
      %196 = vector.broadcast %188 : vector<16x1xf32> to vector<16x32xf32>
      %197 = arith.subf %182, %196 : vector<16x32xf32>
      %cst_102 = arith.constant 9.99999996E-13 : f32
      %198 = vector.broadcast %cst_102 : f32 to vector<16x1xf32>
      %199 = arith.addf %195, %198 : vector<16x1xf32>
      %200 = math.rsqrt %199 : vector<16x1xf32>
      %201 = vector.broadcast %200 : vector<16x1xf32> to vector<16x32xf32>
      %202 = arith.mulf %197, %201 : vector<16x32xf32>
      %203 = vector.broadcast %183 : vector<1x32xf32> to vector<16x32xf32>
      %204 = arith.mulf %202, %203 : vector<16x32xf32>
      %205 = vector.broadcast %184 : vector<1x32xf32> to vector<16x32xf32>
      %206 = arith.addf %204, %205 : vector<16x32xf32>
      %c0_103 = arith.constant 0 : index
      %c0_104 = arith.constant 0 : index
      %207 = vector.load %arg23[%c0_103, %c0_104] : memref<16x32xf32, #tpu.memory_space<vmem>>, vector<16x32xf32>
      tpu.vector_store %arg23[%c0_103, %c0_104], %206 {strides = array<i32>} : memref<16x32xf32, #tpu.memory_space<vmem>>, vector<16x32xf32>,
    } else {
    }
    %c0 = arith.constant 0 : index
    %c0_1 = arith.constant 0 : index
    %3 = vector.load %arg23[%c0, %c0_1] : memref<16x32xf32, #tpu.memory_space<vmem>>, vector<16x32xf32>
    %4 = arith.truncf %3 : vector<16x32xf32> to vector<16x32xbf16>
    %c0_2 = arith.constant 0 : index
    %c0_3 = arith.constant 0 : index
    %c0_4 = arith.constant 0 : index
    %5 = vector.load %arg6[%c0_2, %c0_3, %c0_4] : memref<1x32x32xbf16, #tpu.memory_space<vmem>>, vector<1x32x32xbf16>
    %6 = vector.shape_cast %5 : vector<1x32x32xbf16> to vector<32x32xbf16>
    %cst = arith.constant dense<0.000000e+00> : vector<16x32xf32>
    %7 = tpu.matmul %4, %6, %cst {dimension_numbers = #tpu.dot_dimension_numbers<[1], [0], [0], [1], [0, 0, 1, 1], [], []>} : vector<16x32xbf16>, vector<32x32xbf16>, vector<16x32xf32> -> vector<16x32xf32>
    %c0_5 = arith.constant 0 : index
    %c0_6 = arith.constant 0 : index
    %c0_7 = arith.constant 0 : index
    %8 = vector.load %arg7[%c0_5, %c0_6, %c0_7] : memref<1x1x32xf32, #tpu.memory_space<vmem>>, vector<1x1x32xf32>
    %9 = vector.shape_cast %8 : vector<1x1x32xf32> to vector<1x32xf32>
    %10 = vector.broadcast %9 : vector<1x32xf32> to vector<16x32xf32>
    %11 = arith.addf %7, %10 : vector<16x32xf32>
    %c0_8 = arith.constant 0 : index
    %c0_9 = arith.constant 0 : index
    %c0_10 = arith.constant 0 : index
    %12 = vector.load %arg8[%c0_8, %c0_9, %c0_10] : memref<1x32x32xbf16, #tpu.memory_space<vmem>>, vector<1x32x32xbf16>
    %13 = vector.shape_cast %12 : vector<1x32x32xbf16> to vector<32x32xbf16>
    %cst_11 = arith.constant dense<0.000000e+00> : vector<16x32xf32>
    %14 = tpu.matmul %4, %13, %cst_11 {dimension_numbers = #tpu.dot_dimension_numbers<[1], [0], [0], [1], [0, 0, 1, 1], [], []>} : vector<16x32xbf16>, vector<32x32xbf16>, vector<16x32xf32> -> vector<16x32xf32>
    %c0_12 = arith.constant 0 : index
    %c0_13 = arith.constant 0 : index
    %c0_14 = arith.constant 0 : index
    %15 = vector.load %arg9[%c0_12, %c0_13, %c0_14] : memref<1x1x32xf32, #tpu.memory_space<vmem>>, vector<1x1x32xf32>
    %16 = vector.shape_cast %15 : vector<1x1x32xf32> to vector<1x32xf32>
    %17 = vector.broadcast %16 : vector<1x32xf32> to vector<16x32xf32>
    %18 = arith.addf %14, %17 : vector<16x32xf32>
    %c0_15 = arith.constant 0 : index
    %c0_16 = arith.constant 0 : index
    %c0_17 = arith.constant 0 : index
    %19 = vector.load %arg10[%c0_15, %c0_16, %c0_17] : memref<1x32x32xbf16, #tpu.memory_space<vmem>>, vector<1x32x32xbf16>
    %20 = vector.shape_cast %19 : vector<1x32x32xbf16> to vector<32x32xbf16>
    %cst_18 = arith.constant dense<0.000000e+00> : vector<16x32xf32>
    %21 = tpu.matmul %4, %20, %cst_18 {dimension_numbers = #tpu.dot_dimension_numbers<[1], [0], [0], [1], [0, 0, 1, 1], [], []>} : vector<16x32xbf16>, vector<32x32xbf16>, vector<16x32xf32> -> vector<16x32xf32>
    %c0_19 = arith.constant 0 : index
    %c0_20 = arith.constant 0 : index
    %c0_21 = arith.constant 0 : index
    %22 = vector.load %arg11[%c0_19, %c0_20, %c0_21] : memref<1x1x32xf32, #tpu.memory_space<vmem>>, vector<1x1x32xf32>
    %23 = vector.shape_cast %22 : vector<1x1x32xf32> to vector<1x32xf32>
    %24 = vector.broadcast %23 : vector<1x32xf32> to vector<16x32xf32>
    %25 = arith.addf %21, %24 : vector<16x32xf32>
    %c0_22 = arith.constant 0 : index
    %c0_23 = arith.constant 0 : index
    %c0_24 = arith.constant 0 : index
    %26 = vector.load %arg3[%c0_22, %c0_23, %c0_24] : memref<2x1x8xf32, #tpu.memory_space<vmem>>, vector<2x1x8xf32>
    %27 = vector.shape_cast %26 : vector<2x1x8xf32> to vector<2x1x8xf32>
    %28 = vector.broadcast %27 : vector<2x1x8xf32> to vector<2x8x8xf32>
    %29 = vector.extract_strided_slice %11 {offsets = [0, 0], sizes = [16, 16], strides = [1, 1]} : vector<16x32xf32> to vector<16x16xf32>
    %cst_25 = arith.constant 2.500000e-01 : f32
    %30 = vector.broadcast %cst_25 : f32 to vector<16x16xf32>
    %31 = arith.mulf %29, %30 : vector<16x16xf32>
    %32 = vector.shape_cast %31 : vector<16x16xf32> to vector<2x8x16xf32>
    %33 = arith.truncf %32 : vector<2x8x16xf32> to vector<2x8x16xbf16>
    %34 = vector.extract_strided_slice %18 {offsets = [0, 0], sizes = [16, 16], strides = [1, 1]} : vector<16x32xf32> to vector<16x16xf32>
    %35 = vector.shape_cast %34 : vector<16x16xf32> to vector<2x8x16xf32>
    %36 = arith.truncf %35 : vector<2x8x16xf32> to vector<2x8x16xbf16>
    %37 = vector.extract_strided_slice %25 {offsets = [0, 0], sizes = [16, 16], strides = [1, 1]} : vector<16x32xf32> to vector<16x16xf32>
    %38 = vector.shape_cast %37 : vector<16x16xf32> to vector<2x8x16xf32>
    %39 = arith.truncf %38 : vector<2x8x16xf32> to vector<2x8x16xbf16>
    "tpu.trace_start"() <{level = 10 : i32, message = "bqd,bkd->bqk"}> : () -> ()
    %cst_26 = arith.constant dense<0.000000e+00> : vector<2x8x8xf32>
    %40 = tpu.matmul %33, %36, %cst_26 {dimension_numbers = #tpu.dot_dimension_numbers<[2], [2], [1], [1], [0, 0, 0, 1, 1, 1], [0], [0]>} : vector<2x8x16xbf16>, vector<2x8x16xbf16>, vector<2x8x8xf32> -> vector<2x8x8xf32>
    "tpu.trace_stop"() : () -> ()
    %41 = arith.addf %40, %28 : vector<2x8x8xf32>
    %cst_27 = arith.constant dense<0xFF800000> : vector<2x8xf32>
    %42 = vector.multi_reduction <maximumf>, %41, %cst_27 [2] : vector<2x8x8xf32> to vector<2x8xf32>
    %43 = vector.shape_cast %42 : vector<2x8xf32> to vector<2x8x1xf32>
    %44 = vector.broadcast %43 : vector<2x8x1xf32> to vector<2x8x8xf32>
    %45 = arith.subf %41, %44 : vector<2x8x8xf32>
    %46 = math.exp %45 : vector<2x8x8xf32>
    %cst_28 = arith.constant dense<0.000000e+00> : vector<2x8xf32>
    %47 = vector.multi_reduction <add>, %46, %cst_28 [2] : vector<2x8x8xf32> to vector<2x8xf32>
    %48 = vector.shape_cast %47 : vector<2x8xf32> to vector<2x8x1xf32>
    %49 = tpu.reciprocal %48 {approx = true} : vector<2x8x1xf32> -> vector<2x8x1xf32>
    %50 = vector.broadcast %49 : vector<2x8x1xf32> to vector<2x8x8xf32>
    %51 = arith.mulf %46, %50 : vector<2x8x8xf32>
    %52 = arith.truncf %51 : vector<2x8x8xf32> to vector<2x8x8xbf16>
    "tpu.trace_start"() <{level = 10 : i32, message = "bqk,bkd->bqd"}> : () -> ()
    %cst_29 = arith.constant dense<0.000000e+00> : vector<2x8x16xf32>
    %53 = tpu.matmul %52, %39, %cst_29 {dimension_numbers = #tpu.dot_dimension_numbers<[2], [1], [1], [2], [0, 0, 0, 1, 1, 2], [0], [0]>} : vector<2x8x8xbf16>, vector<2x8x16xbf16>, vector<2x8x16xf32> -> vector<2x8x16xf32>
    "tpu.trace_stop"() : () -> ()
    %54 = vector.shape_cast %53 : vector<2x8x16xf32> to vector<16x16xf32>
    %55 = arith.truncf %54 : vector<16x16xf32> to vector<16x16xbf16>
    %c0_30 = arith.constant 0 : index
    %c0_31 = arith.constant 0 : index
    %56 = vector.load %arg24[%c0_30, %c0_31] : memref<16x32xbf16, #tpu.memory_space<vmem>>, vector<16x16xbf16>
    tpu.vector_store %arg24[%c0_30, %c0_31], %55 {strides = array<i32>} : memref<16x32xbf16, #tpu.memory_space<vmem>>, vector<16x16xbf16>,
    %57 = vector.extract_strided_slice %11 {offsets = [0, 16], sizes = [16, 16], strides = [1, 1]} : vector<16x32xf32> to vector<16x16xf32>
    %cst_32 = arith.constant 2.500000e-01 : f32
    %58 = vector.broadcast %cst_32 : f32 to vector<16x16xf32>
    %59 = arith.mulf %57, %58 : vector<16x16xf32>
    %60 = vector.shape_cast %59 : vector<16x16xf32> to vector<2x8x16xf32>
    %61 = arith.truncf %60 : vector<2x8x16xf32> to vector<2x8x16xbf16>
    %62 = vector.extract_strided_slice %18 {offsets = [0, 16], sizes = [16, 16], strides = [1, 1]} : vector<16x32xf32> to vector<16x16xf32>
    %63 = vector.shape_cast %62 : vector<16x16xf32> to vector<2x8x16xf32>
    %64 = arith.truncf %63 : vector<2x8x16xf32> to vector<2x8x16xbf16>
    %65 = vector.extract_strided_slice %25 {offsets = [0, 16], sizes = [16, 16], strides = [1, 1]} : vector<16x32xf32> to vector<16x16xf32>
    %66 = vector.shape_cast %65 : vector<16x16xf32> to vector<2x8x16xf32>
    %67 = arith.truncf %66 : vector<2x8x16xf32> to vector<2x8x16xbf16>
    "tpu.trace_start"() <{level = 10 : i32, message = "bqd,bkd->bqk"}> : () -> ()
    %cst_33 = arith.constant dense<0.000000e+00> : vector<2x8x8xf32>
    %68 = tpu.matmul %61, %64, %cst_33 {dimension_numbers = #tpu.dot_dimension_numbers<[2], [2], [1], [1], [0, 0, 0, 1, 1, 1], [0], [0]>} : vector<2x8x16xbf16>, vector<2x8x16xbf16>, vector<2x8x8xf32> -> vector<2x8x8xf32>
    "tpu.trace_stop"() : () -> ()
    %69 = arith.addf %68, %28 : vector<2x8x8xf32>
    %cst_34 = arith.constant dense<0xFF800000> : vector<2x8xf32>
    %70 = vector.multi_reduction <maximumf>, %69, %cst_34 [2] : vector<2x8x8xf32> to vector<2x8xf32>
    %71 = vector.shape_cast %70 : vector<2x8xf32> to vector<2x8x1xf32>
    %72 = vector.broadcast %71 : vector<2x8x1xf32> to vector<2x8x8xf32>
    %73 = arith.subf %69, %72 : vector<2x8x8xf32>
    %74 = math.exp %73 : vector<2x8x8xf32>
    %cst_35 = arith.constant dense<0.000000e+00> : vector<2x8xf32>
    %75 = vector.multi_reduction <add>, %74, %cst_35 [2] : vector<2x8x8xf32> to vector<2x8xf32>
    %76 = vector.shape_cast %75 : vector<2x8xf32> to vector<2x8x1xf32>
    %77 = tpu.reciprocal %76 {approx = true} : vector<2x8x1xf32> -> vector<2x8x1xf32>
    %78 = vector.broadcast %77 : vector<2x8x1xf32> to vector<2x8x8xf32>
    %79 = arith.mulf %74, %78 : vector<2x8x8xf32>
    %80 = arith.truncf %79 : vector<2x8x8xf32> to vector<2x8x8xbf16>
    "tpu.trace_start"() <{level = 10 : i32, message = "bqk,bkd->bqd"}> : () -> ()
    %cst_36 = arith.constant dense<0.000000e+00> : vector<2x8x16xf32>
    %81 = tpu.matmul %80, %67, %cst_36 {dimension_numbers = #tpu.dot_dimension_numbers<[2], [1], [1], [2], [0, 0, 0, 1, 1, 2], [0], [0]>} : vector<2x8x8xbf16>, vector<2x8x16xbf16>, vector<2x8x16xf32> -> vector<2x8x16xf32>
    "tpu.trace_stop"() : () -> ()
    %82 = vector.shape_cast %81 : vector<2x8x16xf32> to vector<16x16xf32>
    %83 = arith.truncf %82 : vector<16x16xf32> to vector<16x16xbf16>
    %c0_37 = arith.constant 0 : index
    %c16 = arith.constant 16 : index
    %84 = vector.load %arg24[%c0_37, %c16] : memref<16x32xbf16, #tpu.memory_space<vmem>>, vector<16x16xbf16>
    tpu.vector_store %arg24[%c0_37, %c16], %83 {strides = array<i32>} : memref<16x32xbf16, #tpu.memory_space<vmem>>, vector<16x16xbf16>,
    %c0_38 = arith.constant 0 : index
    %c0_39 = arith.constant 0 : index
    %85 = vector.load %arg24[%c0_38, %c0_39] : memref<16x32xbf16, #tpu.memory_space<vmem>>, vector<16x32xbf16>
    %c0_40 = arith.constant 0 : index
    %c0_41 = arith.constant 0 : index
    %c0_42 = arith.constant 0 : index
    %86 = vector.load %arg12[%c0_40, %c0_41, %c0_42] : memref<1x32x32xbf16, #tpu.memory_space<vmem>>, vector<1x32x32xbf16>
    %87 = vector.shape_cast %86 : vector<1x32x32xbf16> to vector<32x32xbf16>
    %cst_43 = arith.constant dense<0.000000e+00> : vector<16x32xf32>
    %88 = tpu.matmul %85, %87, %cst_43 {dimension_numbers = #tpu.dot_dimension_numbers<[1], [0], [0], [1], [0, 0, 1, 1], [], []>} : vector<16x32xbf16>, vector<32x32xbf16>, vector<16x32xf32> -> vector<16x32xf32>
    %c0_44 = arith.constant 0 : index
    %c0_45 = arith.constant 0 : index
    %c0_46 = arith.constant 0 : index
    %89 = vector.load %arg13[%c0_44, %c0_45, %c0_46] : memref<1x1x32xf32, #tpu.memory_space<vmem>>, vector<1x1x32xf32>
    %90 = vector.shape_cast %89 : vector<1x1x32xf32> to vector<1x32xf32>
    %91 = vector.broadcast %90 : vector<1x32xf32> to vector<16x32xf32>
    %92 = arith.addf %88, %91 : vector<16x32xf32>
    %93 = arith.addf %92, %3 : vector<16x32xf32>
    %c0_47 = arith.constant 0 : index
    %c0_48 = arith.constant 0 : index
    %c0_49 = arith.constant 0 : index
    %94 = vector.load %arg14[%c0_47, %c0_48, %c0_49] : memref<1x1x32xf32, #tpu.memory_space<vmem>>, vector<1x1x32xf32>
    %95 = vector.shape_cast %94 : vector<1x1x32xf32> to vector<1x32xf32>
    %c0_50 = arith.constant 0 : index
    %c0_51 = arith.constant 0 : index
    %c0_52 = arith.constant 0 : index
    %96 = vector.load %arg15[%c0_50, %c0_51, %c0_52] : memref<1x1x32xf32, #tpu.memory_space<vmem>>, vector<1x1x32xf32>
    %97 = vector.shape_cast %96 : vector<1x1x32xf32> to vector<1x32xf32>
    %cst_53 = arith.constant dense<0.000000e+00> : vector<16xf32>
    %98 = vector.multi_reduction <add>, %93, %cst_53 [1] : vector<16x32xf32> to vector<16xf32>
    %99 = vector.shape_cast %98 : vector<16xf32> to vector<16x1xf32>
    %cst_54 = arith.constant 3.200000e+01 : f32
    %100 = vector.broadcast %cst_54 : f32 to vector<16x1xf32>
    %101 = arith.divf %99, %100 : vector<16x1xf32>
    %102 = vector.broadcast %101 : vector<16x1xf32> to vector<16x32xf32>
    %103 = arith.subf %93, %102 : vector<16x32xf32>
    %104 = arith.mulf %103, %103 : vector<16x32xf32>
    %cst_55 = arith.constant dense<0.000000e+00> : vector<16xf32>
    %105 = vector.multi_reduction <add>, %104, %cst_55 [1] : vector<16x32xf32> to vector<16xf32>
    %106 = vector.shape_cast %105 : vector<16xf32> to vector<16x1xf32>
    %cst_56 = arith.constant 3.200000e+01 : f32
    %107 = vector.broadcast %cst_56 : f32 to vector<16x1xf32>
    %108 = arith.divf %106, %107 : vector<16x1xf32>
    %109 = vector.broadcast %101 : vector<16x1xf32> to vector<16x32xf32>
    %110 = arith.subf %93, %109 : vector<16x32xf32>
    %cst_57 = arith.constant 9.99999996E-13 : f32
    %111 = vector.broadcast %cst_57 : f32 to vector<16x1xf32>
    %112 = arith.addf %108, %111 : vector<16x1xf32>
    %113 = math.rsqrt %112 : vector<16x1xf32>
    %114 = vector.broadcast %113 : vector<16x1xf32> to vector<16x32xf32>
    %115 = arith.mulf %110, %114 : vector<16x32xf32>
    %116 = vector.broadcast %95 : vector<1x32xf32> to vector<16x32xf32>
    %117 = arith.mulf %115, %116 : vector<16x32xf32>
    %118 = vector.broadcast %97 : vector<1x32xf32> to vector<16x32xf32>
    %119 = arith.addf %117, %118 : vector<16x32xf32>
    %120 = arith.truncf %119 : vector<16x32xf32> to vector<16x32xbf16>
    %c0_58 = arith.constant 0 : index
    %c0_59 = arith.constant 0 : index
    %c0_60 = arith.constant 0 : index
    %121 = vector.load %arg16[%c0_58, %c0_59, %c0_60] : memref<1x32x64xbf16, #tpu.memory_space<vmem>>, vector<1x32x64xbf16>
    %122 = vector.shape_cast %121 : vector<1x32x64xbf16> to vector<32x64xbf16>
    %cst_61 = arith.constant dense<0.000000e+00> : vector<16x64xf32>
    %123 = tpu.matmul %120, %122, %cst_61 {dimension_numbers = #tpu.dot_dimension_numbers<[1], [0], [0], [1], [0, 0, 1, 1], [], []>} : vector<16x32xbf16>, vector<32x64xbf16>, vector<16x64xf32> -> vector<16x64xf32>
    %c0_62 = arith.constant 0 : index
    %c0_63 = arith.constant 0 : index
    %c0_64 = arith.constant 0 : index
    %124 = vector.load %arg17[%c0_62, %c0_63, %c0_64] : memref<1x1x64xf32, #tpu.memory_space<vmem>>, vector<1x1x64xf32>
    %125 = vector.shape_cast %124 : vector<1x1x64xf32> to vector<1x64xf32>
    %126 = vector.broadcast %125 : vector<1x64xf32> to vector<16x64xf32>
    %127 = arith.addf %123, %126 : vector<16x64xf32>
    %cst_65 = arith.constant 5.000000e-01 : f32
    %128 = vector.broadcast %cst_65 : f32 to vector<16x64xf32>
    %129 = arith.mulf %128, %127 : vector<16x64xf32>
    %cst_66 = arith.constant 4.471500e-02 : f32
    %130 = vector.broadcast %cst_66 : f32 to vector<16x64xf32>
    %131 = arith.mulf %130, %127 : vector<16x64xf32>
    %132 = arith.mulf %131, %127 : vector<16x64xf32>
    %133 = arith.mulf %132, %127 : vector<16x64xf32>
    %134 = arith.addf %127, %133 : vector<16x64xf32>
    %cst_67 = arith.constant 0.797884583 : f32
    %135 = vector.broadcast %cst_67 : f32 to vector<16x64xf32>
    %136 = arith.mulf %135, %134 : vector<16x64xf32>
    %137 = math.tanh %136 : vector<16x64xf32>
    %cst_68 = arith.constant 1.000000e+00 : f32
    %138 = vector.broadcast %cst_68 : f32 to vector<16x64xf32>
    %139 = arith.addf %138, %137 : vector<16x64xf32>
    %140 = arith.mulf %129, %139 : vector<16x64xf32>
    %141 = arith.truncf %140 : vector<16x64xf32> to vector<16x64xbf16>
    %c0_69 = arith.constant 0 : index
    %c0_70 = arith.constant 0 : index
    %c0_71 = arith.constant 0 : index
    %142 = vector.load %arg18[%c0_69, %c0_70, %c0_71] : memref<1x64x32xbf16, #tpu.memory_space<vmem>>, vector<1x64x32xbf16>
    %143 = vector.shape_cast %142 : vector<1x64x32xbf16> to vector<64x32xbf16>
    %cst_72 = arith.constant dense<0.000000e+00> : vector<16x32xf32>
    %144 = tpu.matmul %141, %143, %cst_72 {dimension_numbers = #tpu.dot_dimension_numbers<[1], [0], [0], [1], [0, 0, 1, 1], [], []>} : vector<16x64xbf16>, vector<64x32xbf16>, vector<16x32xf32> -> vector<16x32xf32>
    %c0_73 = arith.constant 0 : index
    %c0_74 = arith.constant 0 : index
    %c0_75 = arith.constant 0 : index
    %145 = vector.load %arg19[%c0_73, %c0_74, %c0_75] : memref<1x1x32xf32, #tpu.memory_space<vmem>>, vector<1x1x32xf32>
    %146 = vector.shape_cast %145 : vector<1x1x32xf32> to vector<1x32xf32>
    %147 = vector.broadcast %146 : vector<1x32xf32> to vector<16x32xf32>
    %148 = arith.addf %144, %147 : vector<16x32xf32>
    %149 = arith.addf %148, %119 : vector<16x32xf32>
    %c0_76 = arith.constant 0 : index
    %c0_77 = arith.constant 0 : index
    %c0_78 = arith.constant 0 : index
    %150 = vector.load %arg20[%c0_76, %c0_77, %c0_78] : memref<1x1x32xf32, #tpu.memory_space<vmem>>, vector<1x1x32xf32>
    %151 = vector.shape_cast %150 : vector<1x1x32xf32> to vector<1x32xf32>
    %c0_79 = arith.constant 0 : index
    %c0_80 = arith.constant 0 : index
    %c0_81 = arith.constant 0 : index
    %152 = vector.load %arg21[%c0_79, %c0_80, %c0_81] : memref<1x1x32xf32, #tpu.memory_space<vmem>>, vector<1x1x32xf32>
    %153 = vector.shape_cast %152 : vector<1x1x32xf32> to vector<1x32xf32>
    %cst_82 = arith.constant dense<0.000000e+00> : vector<16xf32>
    %154 = vector.multi_reduction <add>, %149, %cst_82 [1] : vector<16x32xf32> to vector<16xf32>
    %155 = vector.shape_cast %154 : vector<16xf32> to vector<16x1xf32>
    %cst_83 = arith.constant 3.200000e+01 : f32
    %156 = vector.broadcast %cst_83 : f32 to vector<16x1xf32>
    %157 = arith.divf %155, %156 : vector<16x1xf32>
    %158 = vector.broadcast %157 : vector<16x1xf32> to vector<16x32xf32>
    %159 = arith.subf %149, %158 : vector<16x32xf32>
    %160 = arith.mulf %159, %159 : vector<16x32xf32>
    %cst_84 = arith.constant dense<0.000000e+00> : vector<16xf32>
    %161 = vector.multi_reduction <add>, %160, %cst_84 [1] : vector<16x32xf32> to vector<16xf32>
    %162 = vector.shape_cast %161 : vector<16xf32> to vector<16x1xf32>
    %cst_85 = arith.constant 3.200000e+01 : f32
    %163 = vector.broadcast %cst_85 : f32 to vector<16x1xf32>
    %164 = arith.divf %162, %163 : vector<16x1xf32>
    %165 = vector.broadcast %157 : vector<16x1xf32> to vector<16x32xf32>
    %166 = arith.subf %149, %165 : vector<16x32xf32>
    %cst_86 = arith.constant 9.99999996E-13 : f32
    %167 = vector.broadcast %cst_86 : f32 to vector<16x1xf32>
    %168 = arith.addf %164, %167 : vector<16x1xf32>
    %169 = math.rsqrt %168 : vector<16x1xf32>
    %170 = vector.broadcast %169 : vector<16x1xf32> to vector<16x32xf32>
    %171 = arith.mulf %166, %170 : vector<16x32xf32>
    %172 = vector.broadcast %151 : vector<1x32xf32> to vector<16x32xf32>
    %173 = arith.mulf %171, %172 : vector<16x32xf32>
    %174 = vector.broadcast %153 : vector<1x32xf32> to vector<16x32xf32>
    %175 = arith.addf %173, %174 : vector<16x32xf32>
    %c0_87 = arith.constant 0 : index
    %c0_88 = arith.constant 0 : index
    %176 = vector.load %arg23[%c0_87, %c0_88] : memref<16x32xf32, #tpu.memory_space<vmem>>, vector<16x32xf32>
    tpu.vector_store %arg23[%c0_87, %c0_88], %175 {strides = array<i32>} : memref<16x32xf32, #tpu.memory_space<vmem>>, vector<16x32xf32>,
    %177 = vector.shape_cast %175 : vector<16x32xf32> to vector<2x8x32xf32>
    %178 = vector.extract_strided_slice %177 {offsets = [0, 0, 0], sizes = [2, 1, 32], strides = [1, 1, 1]} : vector<2x8x32xf32> to vector<2x1x32xf32>
    %179 = vector.shape_cast %178 : vector<2x1x32xf32> to vector<2x32xf32>
    %180 = vector.shape_cast %179 : vector<2x32xf32> to vector<1x2x32xf32>
    %c0_89 = arith.constant 0 : index
    %c0_90 = arith.constant 0 : index
    %c0_91 = arith.constant 0 : index
    %181 = vector.load %arg22[%c0_89, %c0_90, %c0_91] : memref<1x2x32xf32, #tpu.memory_space<vmem>>, vector<1x2x32xf32>
    tpu.vector_store %arg22[%c0_89, %c0_90, %c0_91], %180 {strides = array<i32>} : memref<1x2x32xf32, #tpu.memory_space<vmem>>, vector<1x2x32xf32>,
    return
  }
  func.func @transform_0(%arg0: i32, %arg1: i32) -> (i32, i32) {
    %c0_i32 = arith.constant 0 : i32
    %c0_i32_0 = arith.constant 0 : i32
    return %arg0, %c0_i32 : i32, i32
  }
  func.func @transform_1(%arg0: i32, %arg1: i32) -> (i32, i32, i32) {
    %c0_i32 = arith.constant 0 : i32
    %c0_i32_0 = arith.constant 0 : i32
    %c0_i32_1 = arith.constant 0 : i32
    return %arg0, %c0_i32, %c0_i32_0 : i32, i32, i32
  }
  func.func @transform_2(%arg0: i32, %arg1: i32) -> (i32, i32) {
    %c0_i32 = arith.constant 0 : i32
    %c0_i32_0 = arith.constant 0 : i32
    %c0_i32_1 = arith.constant 0 : i32
    return %c0_i32, %c0_i32_0 : i32, i32
  }
  func.func @transform_3(%arg0: i32, %arg1: i32) -> (i32, i32) {
    %c0_i32 = arith.constant 0 : i32
    %c0_i32_0 = arith.constant 0 : i32
    %c0_i32_1 = arith.constant 0 : i32
    return %c0_i32, %c0_i32_0 : i32, i32
  }
  func.func @transform_4(%arg0: i32, %arg1: i32) -> (i32, i32, i32) {
    %c0_i32 = arith.constant 0 : i32
    %c0_i32_0 = arith.constant 0 : i32
    %c0_i32_1 = arith.constant 0 : i32
    return %arg1, %c0_i32, %c0_i32_0 : i32, i32, i32
  }
  func.func @transform_5(%arg0: i32, %arg1: i32) -> (i32, i32, i32) {
    %c0_i32 = arith.constant 0 : i32
    %c0_i32_0 = arith.constant 0 : i32
    %c0_i32_1 = arith.constant 0 : i32
    return %arg1, %c0_i32, %c0_i32_0 : i32, i32, i32
  }
  func.func @transform_6(%arg0: i32, %arg1: i32) -> (i32, i32, i32) {
    %c0_i32 = arith.constant 0 : i32
    %c0_i32_0 = arith.constant 0 : i32
    %c0_i32_1 = arith.constant 0 : i32
    return %arg1, %c0_i32, %c0_i32_0 : i32, i32, i32
  }
  func.func @transform_7(%arg0: i32, %arg1: i32) -> (i32, i32, i32) {
    %c0_i32 = arith.constant 0 : i32
    %c0_i32_0 = arith.constant 0 : i32
    %c0_i32_1 = arith.constant 0 : i32
    return %arg1, %c0_i32, %c0_i32_0 : i32, i32, i32
  }
  func.func @transform_8(%arg0: i32, %arg1: i32) -> (i32, i32, i32) {
    %c0_i32 = arith.constant 0 : i32
    %c0_i32_0 = arith.constant 0 : i32
    %c0_i32_1 = arith.constant 0 : i32
    return %arg1, %c0_i32, %c0_i32_0 : i32, i32, i32
  }
  func.func @transform_9(%arg0: i32, %arg1: i32) -> (i32, i32, i32) {
    %c0_i32 = arith.constant 0 : i32
    %c0_i32_0 = arith.constant 0 : i32
    %c0_i32_1 = arith.constant 0 : i32
    return %arg1, %c0_i32, %c0_i32_0 : i32, i32, i32
  }
  func.func @transform_10(%arg0: i32, %arg1: i32) -> (i32, i32, i32) {
    %c0_i32 = arith.constant 0 : i32
    %c0_i32_0 = arith.constant 0 : i32
    %c0_i32_1 = arith.constant 0 : i32
    return %arg1, %c0_i32, %c0_i32_0 : i32, i32, i32
  }
  func.func @transform_11(%arg0: i32, %arg1: i32) -> (i32, i32, i32) {
    %c0_i32 = arith.constant 0 : i32
    %c0_i32_0 = arith.constant 0 : i32
    %c0_i32_1 = arith.constant 0 : i32
    return %arg1, %c0_i32, %c0_i32_0 : i32, i32, i32
  }
  func.func @transform_12(%arg0: i32, %arg1: i32) -> (i32, i32, i32) {
    %c0_i32 = arith.constant 0 : i32
    %c0_i32_0 = arith.constant 0 : i32
    %c0_i32_1 = arith.constant 0 : i32
    return %arg1, %c0_i32, %c0_i32_0 : i32, i32, i32
  }
  func.func @transform_13(%arg0: i32, %arg1: i32) -> (i32, i32, i32) {
    %c0_i32 = arith.constant 0 : i32
    %c0_i32_0 = arith.constant 0 : i32
    %c0_i32_1 = arith.constant 0 : i32
    return %arg1, %c0_i32, %c0_i32_0 : i32, i32, i32
  }
  func.func @transform_14(%arg0: i32, %arg1: i32) -> (i32, i32, i32) {
    %c0_i32 = arith.constant 0 : i32
    %c0_i32_0 = arith.constant 0 : i32
    %c0_i32_1 = arith.constant 0 : i32
    return %arg1, %c0_i32, %c0_i32_0 : i32, i32, i32
  }
  func.func @transform_15(%arg0: i32, %arg1: i32) -> (i32, i32, i32) {
    %c0_i32 = arith.constant 0 : i32
    %c0_i32_0 = arith.constant 0 : i32
    %c0_i32_1 = arith.constant 0 : i32
    return %arg1, %c0_i32, %c0_i32_0 : i32, i32, i32
  }
  func.func @transform_16(%arg0: i32, %arg1: i32) -> (i32, i32, i32) {
    %c0_i32 = arith.constant 0 : i32
    %c0_i32_0 = arith.constant 0 : i32
    %c0_i32_1 = arith.constant 0 : i32
    return %arg1, %c0_i32, %c0_i32_0 : i32, i32, i32
  }
  func.func @transform_17(%arg0: i32, %arg1: i32) -> (i32, i32, i32) {
    %c0_i32 = arith.constant 0 : i32
    %c0_i32_0 = arith.constant 0 : i32
    %c0_i32_1 = arith.constant 0 : i32
    return %arg1, %c0_i32, %c0_i32_0 : i32, i32, i32
  }
  func.func @transform_18(%arg0: i32, %arg1: i32) -> (i32, i32, i32) {
    %c0_i32 = arith.constant 0 : i32
    %c0_i32_0 = arith.constant 0 : i32
    %c0_i32_1 = arith.constant 0 : i32
    return %arg1, %c0_i32, %c0_i32_0 : i32, i32, i32
  }
  func.func @transform_19(%arg0: i32, %arg1: i32) -> (i32, i32, i32) {
    %c0_i32 = arith.constant 0 : i32
    %c0_i32_0 = arith.constant 0 : i32
    %c0_i32_1 = arith.constant 0 : i32
    return %arg1, %c0_i32, %c0_i32_0 : i32, i32, i32
  }
  func.func @transform_20(%arg0: i32, %arg1: i32) -> (i32, i32, i32) {
    %c0_i32 = arith.constant 0 : i32
    %c0_i32_0 = arith.constant 0 : i32
    %c0_i32_1 = arith.constant 0 : i32
    return %arg0, %c0_i32, %c0_i32_0 : i32, i32, i32
  }
}

</mosaic_0001>

<bundles_post_ra>
// kernel: tpu_custom_call.1
= control target key start
LH: loop header
LB: loop body
LE: loop exit
PB: predicated region body
PF: predicated region fallthrough
CT: control target
= control target key end

     0   :  { %s3975_s0 = inlined_call_operand.vmem [shape: f32[32,32], index: 0, kind: input, shape index: {}]   ;;  %s3976_s1 = inlined_call_operand.hbm [shape: f32[4,1,8], index: 1, kind: input, shape index: {}]   ;;  %s3977_s2 = inlined_call_operand.hbm [shape: f32[1,32], index: 2, kind: input, shape index: {}]   ;;  %s3978_s3 = inlined_call_operand.hbm [shape: f32[1,32], index: 3, kind: input, shape index: {}]   ;;  %s3979_s4 = inlined_call_operand.vmem [shape: bf16[2,32,32], index: 4, kind: input, shape index: {}]   ;;  %s3980_s5 = inlined_call_operand.vmem [shape: f32[2,1,32], index: 5, kind: input, shape index: {}]   ;;  %s3981_s6 = inlined_call_operand.vmem [shape: bf16[2,32,32], index: 6, kind: input, shape index: {}]   ;;  %s3982_s7 = inlined_call_operand.vmem [shape: f32[2,1,32], index: 7, kind: input, shape index: {}]   ;;  %s3983_s8 = inlined_call_operand.hbm [shape: bf16[2,32,32], index: 8, kind: input, shape index: {}]   ;;  %s3984_s9 = inlined_call_operand.vmem [shape: f32[2,1,32], index: 9, kind: input, shape index: {}]   ;;  %s3985_s10 = inlined_call_operand.hbm [shape: bf16[2,32,32], index: 10, kind: input, shape index: {}]   ;;  %s3986_s11 = inlined_call_operand.vmem [shape: f32[2,1,32], index: 11, kind: input, shape index: {}]   ;;  %s3987_s12 = inlined_call_operand.vmem [shape: f32[2,1,32], index: 12, kind: input, shape index: {}]   ;;  %s3988_s13 = inlined_call_operand.vmem [shape: f32[2,1,32], index: 13, kind: input, shape index: {}]   ;;  %s3989_s14 = inlined_call_operand.hbm [shape: bf16[2,32,64], index: 14, kind: input, shape index: {}]   ;;  %s3990_s15 = inlined_call_operand.vmem [shape: f32[2,1,64], index: 15, kind: input, shape index: {}]   ;;  %s3991_s16 = inlined_call_operand.vmem [shape: bf16[2,64,32], index: 16, kind: input, shape index: {}]   ;;  %s3992_s17 = inlined_call_operand.vmem [shape: f32[2,1,32], index: 17, kind: input, shape index: {}]   ;;  %s3993_s18 = inlined_call_operand.vmem [shape: f32[2,1,32], index: 18, kind: input, shape index: {}]   ;;  %s3994_s19 = inlined_call_operand.vmem [shape: f32[2,1,32], index: 19, kind: input, shape index: {}]   ;;  %s3995_s20 = inlined_call_operand.hbm [shape: f32[2,2,32], index: 20, kind: output, shape index: {}]  }
   0x1   :  { %4038 = sst [smem:[#allocation37_spill]] %s3975_s0 }
   0x2   :  { %4039 = sst [smem:[#allocation38_spill]] %s3976_s1 }
   0x3   :  { %4040 = sst [smem:[#allocation39_spill]] %s3977_s2 }
   0x4   :  { %4041 = sst [smem:[#allocation40_spill]] %s3978_s3 }
   0x5   :  { %4042 = sst [smem:[#allocation41_spill]] %s3979_s4 }
   0x6   :  { %4043 = sst [smem:[#allocation42_spill]] %s3980_s5 }
   0x7   :  { %4044 = sst [smem:[#allocation43_spill]] %s3981_s6 }
   0x8   :  { %4045 = sst [smem:[#allocation44_spill]] %s3982_s7 }
   0x9   :  { %4046 = sst [smem:[#allocation45_spill]] %s3983_s8 }
   0xa   :  { %4047 = sst [smem:[#allocation46_spill]] %s3984_s9 }
   0xb   :  { %4048 = sst [smem:[#allocation47_spill]] %s3985_s10 }
   0xc   :  { %4049 = sst [smem:[#allocation48_spill]] %s3986_s11 }
   0xd   :  { %4050 = sst [smem:[#allocation49_spill]] %s3987_s12 }
   0xe   :  { %4051 = sst [smem:[#allocation50_spill]] %s3988_s13 }
   0xf   :  { %4052 = sst [smem:[#allocation51_spill]] %s3989_s14 }
  0x10   :  { %4053 = sst [smem:[#allocation52_spill]] %s3990_s15 }
  0x11   :  { %4054 = sst [smem:[#allocation53_spill]] %s3991_s16 }
  0x12   :  { %4055 = sst [smem:[#allocation54_spill]] %s3992_s17 }
  0x13   :  { %4056 = sst [smem:[#allocation55_spill]] %s3993_s18 }
  0x14   :  { %4057 = sst [smem:[#allocation56_spill]] %s3994_s19 }
  0x15   :  { %4058 = sst [smem:[#allocation57_spill]] %s3995_s20 }
  0x16   :  { %25 = vsyncpa [#allocation5], 0 }
  0x17   :  { %27 = vsyncpa [#allocation5 + $0x1], 0 }
  0x18   :  { %28 = vsyncpa [#allocation8], 0 }
  0x19   :  { %29 = vsyncpa [#allocation11], 0 }
  0x1a   :  { %31 = vsyncpa [#allocation11 + $0x1], 0 }
  0x1b   :  { %32 = vsyncpa [#allocation14], 0 }
  0x1c   :  { %34 = vsyncpa [#allocation14 + $0x1], 0 }
  0x1d   :  { %35 = vsyncpa [#allocation6], 0 }
  0x1e   :  { %37 = vsyncpa [#allocation6 + $0x1], 0  ;;  %s3255_s1 = smov 0   ;;  %s3257_s22 = smov 0  }
  0x1f   :  { %s3259_s23 = smov 0   ;;  %s3261_s24 = smov 0  }
  0x20   :  { %s3263_s2 = smov 0   ;;  %s3265_s25 = smov 0  }
  0x21   :  { %s3267_s3 = smov 0   ;;  %s3269_s26 = smov 0  }
  0x22   :  { %s3271_s27 = smov 0   ;;  %s3273_s28 = smov 0  }
  0x23   :  { %s3275_s4 = smov 0  }
  0x24 LB: > { %4059 = sst [smem:[#allocation21_spill]] %s3097_s22  ;;  %s3309_s29 = sadd.s32 4294967295, %s3133_s4   ;;  %s3133_s4 = sphi %s3275_s4, %s43_s4   ;;  %s3129_s28 = sphi %s3273_s28, %s4166_s28   ;;  %s3125_s27 = sphi %s3271_s27, %s4165_s27   ;;  %s3121_s26 = sphi %s3269_s26, %s4164_s26   ;;  %s3117_s3 = sphi %s3267_s3, %s4163_s3   ;;  %s3113_s25 = sphi %s3265_s25, %s4162_s25   ;;  %s3109_s2 = sphi %s3263_s2, %s4161_s2   ;;  %s3105_s24 = sphi %s3261_s24, %s4160_s24   ;;  %s3101_s23 = sphi %s3259_s23, %s4159_s23   ;;  %s3097_s22 = sphi %s3257_s22, %s4158_s22   ;;  %s3093_s1 = sphi %s3255_s1, %s4157_s1  }
  0x25   : > { %4060 = sst [smem:[#allocation22_spill]] %s3101_s23  ;;  %s2408_s30 = sadd.s32 4294967294, %s3133_s4  }
  0x26   : > { %4061 = sst [smem:[#allocation23_spill]] %s3105_s24  ;;  %p101_p0 = scmp.ne.s32.totalorder %s3109_s2, %s3105_s24 }
  0x27   : > { %4062 = sst [smem:[#allocation24_spill]] %s3109_s2  ;;  %p4002_p1 = scmp.eq.s32.totalorder %s3309_s29, 0 }
  0x28   : > { %4063 = sst [smem:[#allocation25_spill]] %s3113_s25  ;;  %p273_p2 = scmp.ne.s32.totalorder %s3097_s22, %s3093_s1 }
  0x29   : > { %4064 = sst [smem:[#allocation26_spill]] %s3117_s3  ;;  %p3319_p4 = por %p4002_p1, %p101_p0 }
  0x2a   : > { %4065 = sst [smem:[#allocation27_spill]] %s3121_s26  ;;  %p589_p5 = scmp.eq.s32.totalorder %s2408_s30, 3 }
  0x2b   : > { %4066 = sst [smem:[#allocation28_spill]] %s3125_s27  ;;  %p3325_p6 = por %p273_p2, %p4002_p1 }
  0x2c   : > { %4067 = sst [smem:[#allocation29_spill]] %s3129_s28  ;;  %p2409_p7 = scmp.ge.s32.totalorder %s3133_s4, 1 }
  0x2d   : > { %4068 = sst [smem:[#allocation30_spill]] %s3133_s4  ;;  %p3330_p8 = por %p589_p5, %p101_p0 }
  0x2e   : > { %s4069_s0 = scalar_select %p3319_p4, 1, 0 }
  0x2f   : > { %s4070_s21 = scalar_select %p3325_p6, 1, 0 }
  0x30   : > { %s4072_s20 = scalar_select %p3330_p8, 1, 0 }
  0x31   : > { %4071 = sst [smem:[#allocation31_spill]] %s4070_s21  ;;  %p596_p9 = scmp.lt.s32.totalorder %s3133_s4, 5 }
  0x32   : > { %4073 = sst [smem:[#allocation32_spill]] %s4072_s20  ;;  %s3135_s24 = smov [#allocation7]  }
  0x33   : > { %p3335_p10 = pnand %p2409_p7, %p596_p9  ;;  %s609_s19 = sshll.u32 %s3135_s24, 4  ;;  %s610_s19 = int_to_ptr.vmem [resolvable:$true] %s609_s19 }
  0x34   : > { %s52_s18 = sadd.s32 1, %s3125_s27  ;;  %s4077_s15 = sld [smem:[#allocation39_spill]] }
  0x35   : > { %s4074_s1 = scalar_select %p3335_p10, 1, 0 }
  0x36   : > { %p2649_p11 = pneg %p3335_p10  ;;  %p3349_p0 = scmp.ge.s32.totalorder %s52_s18, 2 }
  0x38   : > { %p3343_p12 = pnand %p2649_p11, %p4002_p1 }
  0x39   : > { %s4076_s20 = scalar_select %p3349_p0, 1, 0 }
  0x3a   : > { %s4075_s30 = scalar_select %p3343_p12, 1, 0 }
  0x3b   : > { %s2823_s24 = scalar_lea.hbm %s4077_s15, 16  ;;  %p4012_p5 = pneg %p3343_p12 }
  0x3c   : > { %p2824_p2 = scmp.ne.s32.totalorder %s4077_s15, %s2823_s24  ;;  %p2830_p11 = scmp.lt.u32.totalorder %s2823_s24, %s4077_s15 }
  0x3e   : > { %p2826_p7 = pnand %p4012_p5, %p2824_p2 }
  0x40   : > { %p2827_p9 = pneg %p2826_p7 }
  0x42   : > { %p2832_p1 = pnand %p2830_p11, %p2827_p9 }
  0x44   : > { %2835 = shalt.err (!%p2832_p1)
}
  0x45   : > { %s2836_s7 = scalar_lea.vmem %s610_s19, 16  ;;  %s2843_s12 = scalar_lea.vmem %s610_s19, 32 }
  0x46   : > { %p2837_p3 = scmp.ne.s32.totalorder %s610_s19, %s2836_s7  ;;  %p2844_p6 = scmp.lt.s32.totalorder %s610_s19, %s610_s19 }
  0x47   : > { %p2845_p4 = scmp.lt.s32.totalorder %s2843_s12, %s2836_s7 }
  0x48   : > { %p2839_p13 = pnand %p2837_p3, %p4012_p5 }
  0x49   : > { %p2846_p10 = por %p2845_p4, %p2844_p6 }
  0x4a   : > { %p2840_p8 = pneg %p2839_p13 }
  0x4c   : > { %p2847_p0 = pnand %p2846_p10, %p2840_p8 }
  0x4e   : > { %2850 = shalt.err (!%p2847_p0)
}
  0x4f   : > { %2652 = dma.hbm_to_vmem [thread:$0]  (!%p3343_p12), %s4077_s15, 16, %s610_s19, [#allocation8]  }
  0x50   : > { %p4078_p1 = scmp.ne.s32.totalorder %s4076_s20, 0  ;;  %s260_s7 = sadd.s32 1, %s3101_s23 }
  0x51   : > { %p267_p3 = scmp.ne.s32.totalorder %s3101_s23, %s3097_s22  ;;  %p4011_p4 = scmp.lt.s32.totalorder %s3133_s4, 4 }
  0x52   : > { %s4168_s18 = smov (%p4078_p1, %s52_s18), 0  ;;  %p4080_p8 = scmp.eq.s32.totalorder %s3133_s4, 0 }
  0x53   : > { %4079 = sst [smem:[#allocation33_spill]] %s4168_s18  ;;  %s257_s11 = ssub.s32 %s3125_s27, %s4168_s18 }
  0x54   : > { %p258_p6 = scmp.eq.s32.totalorder %s257_s11, 0  ;;  %p269_p10 = por %p267_p3, %p4080_p8 }
  0x55   : > { %s689_s16 = sand.u32 1, %s3133_s4   ;;  %s4009_s17 = sand.u32 1, %s3101_s23  }
  0x56   : > { %s3390_s24 = scalar_select %p258_p6, %s3101_s23, %s260_s7  }
  0x57   : > { %s3394_s12 = sshll.u32 %s4009_s17, 4  ;;  %s3397_s19 = sshll.u32 %s3125_s27, 8 }
  0x58   : > { %4081 = sst [smem:[#allocation34_spill]] %s3390_s24  ;;  %s4082_s8 = sld [smem:[#allocation45_spill]] }
  0x59   : > { %s693_s11 = scalar_lea.vmem [#allocation10], %s3394_s12  ;;  %p3410_p13 = pnand %p4011_p4, %p269_p10 }
  0x5a   : > { %s700_s18 = sshll.u32 %s693_s11, 4  ;;  %s3414_s17 = scalar_lea.sflag [#allocation11], %s689_s16  ;;  %s3406_s18 = int_to_ptr.vmem [resolvable:$true] %s700_s18 }
  0x5b   : > { %s4083_s7 = scalar_select %p3410_p13, 1, 0 }
  0x5c   : > { %p3420_p2 = pneg %p3410_p13 }
  0x5e   : > { %s3403_s15 = scalar_lea.hbm %s4082_s8, %s3397_s19  ;;  %s2856_s24 = scalar_lea.hbm %s4082_s8, 512 }
  0x5f   : > { %s2851_s27 = scalar_lea.hbm %s3403_s15, 256  ;;  %p2857_p11 = scmp.lt.u32.totalorder %s3403_s15, %s4082_s8 }
  0x60   : > { %p2852_p0 = scmp.ne.s32.totalorder %s3403_s15, %s2851_s27  ;;  %p2858_p3 = scmp.lt.u32.totalorder %s2856_s24, %s2851_s27 }
  0x61   : > { %s4084_s13 = scalar_select %p3420_p2, 1, 0 }
  0x62   : > { %p2854_p7 = pnand %p3420_p2, %p2852_p0  ;;  %p2859_p6 = por %p2858_p3, %p2857_p11 }
  0x63   : > { %p2860_p8 = scmp.lt.u32.totalorder %s2851_s27, %s3403_s15 }
  0x64   : > { %p2855_p9 = pneg %p2854_p7 }
  0x65   : > { %p2861_p10 = por %p2860_p8, %p2859_p6 }
  0x67   : > { %p2862_p4 = pnand %p2861_p10, %p2855_p9 }
  0x69   : > { %2865 = shalt.err (!%p2862_p4)
}
  0x6a   : > { %s2866_s16 = scalar_lea.vmem %s3406_s18, 256  ;;  %s3136_s9 = smov [#allocation10]  }
  0x6b   : > { %p2867_p0 = scmp.ne.s32.totalorder %s3406_s18, %s2866_s16  ;;  %s2871_s11 = sshll.u32 %s3136_s9, 4  ;;  %s2872_s11 = int_to_ptr.vmem [resolvable:$false] %s2871_s11 }
  0x6c   : > { %s2873_s5 = scalar_lea.vmem %s2872_s11, 512  ;;  %p2874_p1 = scmp.lt.s32.totalorder %s3406_s18, %s2872_s11 }
  0x6d   : > { %p2869_p7 = pnand %p2867_p0, %p3420_p2  ;;  %p2875_p12 = scmp.lt.s32.totalorder %s2873_s5, %s2866_s16 }
  0x6f   : > { %p2870_p5 = pneg %p2869_p7  ;;  %p2876_p11 = por %p2875_p12, %p2874_p1 }
  0x71   : > { %p2877_p3 = pnand %p2876_p11, %p2870_p5 }
  0x73   : > { %2880 = shalt.err (!%p2877_p3)
}
  0x74   : > { %s4023_s6 = smov 64   ;;  %s4025_s27 = smov 4  }
  0x75   : > { %2662 = dma.hbm_to_vmem [thread:$0]  (!%p3410_p13), %s3403_s15, 256, %s3406_s18, %s3414_s17, %s4023_s6, %s4023_s6, %s4025_s27  }
  0x76   : > { %s3139_s24 = smov [#allocation9]   ;;  %s4085_s5 = sld [smem:[#allocation40_spill]] }
  0x77   : > { %s620_s9 = sshll.u32 %s3139_s24, 4  ;;  %p4086_p5 = scmp.ne.s32.totalorder %s4075_s30, 0  ;;  %s621_s9 = int_to_ptr.vmem [resolvable:$true] %s620_s9 }
  0x79   : > { %p4087_p1 = pneg %p4086_p5 }
  0x7c   : > { %s2881_s8 = scalar_lea.hbm %s4085_s5, 16 }
  0x7d   : > { %p2882_p12 = scmp.ne.s32.totalorder %s4085_s5, %s2881_s8  ;;  %p2888_p6 = scmp.lt.u32.totalorder %s2881_s8, %s4085_s5 }
  0x7f   : > { %p2884_p4 = pnand %p2882_p12, %p4087_p1 }
  0x81   : > { %p2885_p9 = pneg %p2884_p4 }
  0x83   : > { %p2890_p8 = pnand %p2888_p6, %p2885_p9 }
  0x85   : > { %2893 = shalt.err (!%p2890_p8)
}
  0x86   : > { %s2894_s15 = scalar_lea.vmem %s621_s9, 16  ;;  %p4088_p0 = pmov %p4087_p1 }
  0x87   : > { %p2895_p10 = scmp.ne.s32.totalorder %s621_s9, %s2894_s15  ;;  %s2901_s18 = scalar_lea.vmem %s621_s9, 32 }
  0x88   : > { %p2902_p3 = scmp.lt.s32.totalorder %s621_s9, %s621_s9  ;;  %p2903_p13 = scmp.lt.s32.totalorder %s2901_s18, %s2894_s15 }
  0x89   : > { %p2897_p7 = pnand %p2895_p10, %p4088_p0 }
  0x8a   : > { %p2904_p2 = por %p2903_p13, %p2902_p3 }
  0x8b   : > { %p2898_p11 = pneg %p2897_p7 }
  0x8d   : > { %p2905_p1 = pnand %p2904_p2, %p2898_p11 }
  0x8f   : > { %2908 = shalt.err (!%p2905_p1)
}
  0x90   : > { %2655 = dma.hbm_to_vmem [thread:$0]  (!%p4086_p5), %s4085_s5, 16, %s621_s9, [#allocation8]  }
  0x91   : > { %s55_s8 = sadd.s32 1, %s3129_s28  ;;  %s88_s26 = sadd.s32 1, %s3113_s25 }
  0x92   : > { %p4089_p13 = scmp.ne.s32.totalorder %s4076_s20, 0  ;;  %p95_p2 = scmp.ne.s32.totalorder %s3113_s25, %s3109_s2 }
  0x93   : > { %s640_s21 = sand.u32 1, %s3113_s25   ;;  %p4090_p4 = scmp.eq.s32.totalorder %s3133_s4, 0 }
  0x94   : > { %s4170_s8 = smov (!%p4089_p13, %s55_s8), %s3129_s28  ;;  %p4091_p6 = scmp.eq.s32.totalorder %s3309_s29, 3 }
  0x95   : > { %p57_p12 = scmp.ge.s32.totalorder %s4170_s8, 2  ;;  %p97_p9 = por %p4090_p4, %p95_p2 }
  0x96   : > { %p3479_p8 = por %p4091_p6, %p95_p2  ;;  %s2413_s24 = sshll.u32 %s640_s21, 1 }
  0x97   : > { %s4172_s8 = smov (%p57_p12, %s4170_s8), 0  ;;  %s2488_s9 = sshll.u32 %s3129_s28, 5 }
  0x98   : > { %s4092_s30 = scalar_select %p3479_p8, 1, 0 }
  0x99   : > { %4093 = sst [smem:[#allocation35_spill]] %s4172_s8  ;;  %s85_s11 = ssub.s32 %s3129_s28, %s4172_s8 }
  0x9a   : > { %p86_p5 = scmp.eq.s32.totalorder %s85_s11, 0  ;;  %s4094_s15 = sld [smem:[#allocation38_spill]] }
  0x9b   : > { %s644_s3 = scalar_lea.vmem [#allocation4], %s2413_s24  ;;  %p4095_p10 = scmp.lt.s32.totalorder %s3133_s4, 4 }
  0x9c   : > { %s651_s22 = sshll.u32 %s644_s3, 4  ;;  %s3504_s11 = scalar_lea.sflag [#allocation5], %s640_s21  ;;  %s3502_s22 = int_to_ptr.vmem [resolvable:$true] %s651_s22 }
  0x9d   : > { %p3495_p0 = pnand %p4095_p10, %p97_p9 }
  0x9e   : > { %s3500_s27 = scalar_select %p86_p5, %s3113_s25, %s88_s26  }
  0x9f   : > { %p2911_p11 = pneg %p3495_p0 }
  0xa0   : > { %s3491_s18 = scalar_lea.hbm %s4094_s15, %s2488_s9  ;;  %4097 = sst [smem:[#allocation36_spill]] %s3500_s27 }
  0xa1   : > { %s2909_s9 = scalar_lea.hbm %s3491_s18, 32  ;;  %s2914_s16 = scalar_lea.hbm %s4094_s15, 64 }
  0xa2   : > { %p2910_p7 = scmp.ne.s32.totalorder %s3491_s18, %s2909_s9  ;;  %p2915_p13 = scmp.lt.u32.totalorder %s3491_s18, %s4094_s15 }
  0xa3   : > { %p2916_p2 = scmp.lt.u32.totalorder %s2914_s16, %s2909_s9  ;;  %p2918_p4 = scmp.lt.u32.totalorder %s2909_s9, %s3491_s18 }
  0xa4   : > { %p2912_p3 = pnand %p2911_p11, %p2910_p7 }
  0xa5   : > { %p2917_p12 = por %p2916_p2, %p2915_p13 }
  0xa6   : > { %p2913_p1 = pneg %p2912_p3 }
  0xa7   : > { %p2919_p9 = por %p2918_p4, %p2917_p12 }
  0xa9   : > { %p2920_p6 = pnand %p2919_p9, %p2913_p1 }
  0xab   : > { %2923 = shalt.err (!%p2920_p6)
}
  0xac   : > { %s2924_s26 = scalar_lea.vmem %s3502_s22, 32  ;;  %s3140_s21 = smov [#allocation4]  }
  0xad   : > { %p2925_p5 = scmp.ne.s32.totalorder %s3502_s22, %s2924_s26  ;;  %s2929_s24 = sshll.u32 %s3140_s21, 4  ;;  %s2930_s24 = int_to_ptr.vmem [resolvable:$false] %s2929_s24 }
  0xae   : > { %s2931_s5 = scalar_lea.vmem %s2930_s24, 64  ;;  %p2932_p3 = scmp.lt.s32.totalorder %s3502_s22, %s2930_s24 }
  0xaf   : > { %p2927_p10 = pnand %p2925_p5, %p2911_p11  ;;  %p2933_p13 = scmp.lt.s32.totalorder %s2931_s5, %s2924_s26 }
  0xb1   : > { %p2928_p7 = pneg %p2927_p10  ;;  %p2934_p2 = por %p2933_p13, %p2932_p3 }
  0xb3   : > { %p2935_p12 = pnand %p2934_p2, %p2928_p7 }
  0xb5   : > { %2938 = shalt.err (!%p2935_p12)
}
  0xb6   : > { %s3141_s9 = smov 16   ;;  %s3142_s20 = smov 1  }
  0xb7   : > { %2659 = dma.hbm_to_vmem [thread:$0]  (!%p3495_p0), %s3491_s18, 32, %s3502_s22, %s3504_s11, %s3141_s9, %s3141_s9, %s3142_s20  }
  0xb8   : > { %s4098_s10 = sld [smem:[#allocation47_spill]]  ;;  %s720_s26 = scalar_lea.vmem [#allocation12], %s3394_s12 }
  0xb9   : > { %s727_s24 = sshll.u32 %s720_s26, 4  ;;  %p4099_p1 = scmp.ne.s32.totalorder %s4084_s13, 0  ;;  %s3539_s24 = int_to_ptr.vmem [resolvable:$true] %s727_s24 }
  0xbe   : > { %s3536_s21 = scalar_lea.hbm %s4098_s10, %s3397_s19  ;;  %s2944_s22 = scalar_lea.hbm %s4098_s10, 512 }
  0xbf   : > { %s2939_s5 = scalar_lea.hbm %s3536_s21, 256  ;;  %p2945_p0 = scmp.lt.u32.totalorder %s3536_s21, %s4098_s10 }
  0xc0   : > { %p2940_p11 = scmp.ne.s32.totalorder %s3536_s21, %s2939_s5  ;;  %p2946_p6 = scmp.lt.u32.totalorder %s2944_s22, %s2939_s5 }
  0xc1   : > { %p2948_p10 = scmp.lt.u32.totalorder %s2939_s5, %s3536_s21 }
  0xc2   : > { %p2942_p4 = pnand %p2940_p11, %p4099_p1  ;;  %p2947_p5 = por %p2946_p6, %p2945_p0 }
  0xc4   : > { %p2943_p9 = pneg %p2942_p4  ;;  %p2949_p7 = por %p2948_p10, %p2947_p5 }
  0xc6   : > { %p2950_p3 = pnand %p2949_p7, %p2943_p9 }
  0xc8   : > { %2953 = shalt.err (!%p2950_p3)
}
  0xc9   : > { %s2954_s20 = scalar_lea.vmem %s3539_s24, 256  ;;  %s3143_s16 = smov [#allocation12]  }
  0xca   : > { %p2955_p13 = scmp.ne.s32.totalorder %s3539_s24, %s2954_s20  ;;  %s2959_s3 = sshll.u32 %s3143_s16, 4  ;;  %s2960_s3 = int_to_ptr.vmem [resolvable:$false] %s2959_s3 }
  0xcb   : > { %s2961_s26 = scalar_lea.vmem %s2960_s3, 512  ;;  %p2962_p11 = scmp.lt.s32.totalorder %s3539_s24, %s2960_s3 }
  0xcc   : > { %p2957_p2 = pnand %p2955_p13, %p4099_p1  ;;  %p2963_p4 = scmp.lt.s32.totalorder %s2961_s26, %s2954_s20 }
  0xce   : > { %p2958_p12 = pneg %p2957_p2  ;;  %p2964_p0 = por %p2963_p4, %p2962_p11 }
  0xd0   : > { %p2965_p6 = pnand %p2964_p0, %p2958_p12 }
  0xd2   : > { %2968 = shalt.err (!%p2965_p6)
}
  0xd3   : > { %p4100_p9 = scmp.ne.s32.totalorder %s4083_s7, 0  ;;  %s4101_s5 = smov 4  }
  0xd4   : > { %s4102_s6 = smov 64   ;;  %s4103_s14 = sld [smem:[#allocation51_spill]] }
  0xd5   : > { %2665 = dma.hbm_to_vmem [thread:$0]  (!%p4100_p9), %s3536_s21, 256, %s3539_s24, %s3414_s17, %s4102_s6, %s4102_s6, %s4101_s5  }
  0xd6   : > { %s759_s9 = scalar_lea.vmem [#allocation13], %s3394_s12  ;;  %s4104_s16 = sand.u32 1, %s3101_s23  }
  0xd7   : > { %s766_s20 = sshll.u32 %s759_s9, 4  ;;  %s3577_s3 = scalar_lea.sflag [#allocation14], %s4104_s16  ;;  %s3573_s20 = int_to_ptr.vmem [resolvable:$true] %s766_s20 }
  0xda   : > { %s3570_s11 = scalar_lea.hbm %s4103_s14, %s3397_s19  ;;  %s2974_s19 = scalar_lea.hbm %s4103_s14, 512 }
  0xdb   : > { %s2969_s26 = scalar_lea.hbm %s3570_s11, 256  ;;  %p2975_p3 = scmp.lt.u32.totalorder %s3570_s11, %s4103_s14 }
  0xdc   : > { %p2970_p5 = scmp.ne.s32.totalorder %s3570_s11, %s2969_s26  ;;  %p2976_p13 = scmp.lt.u32.totalorder %s2974_s19, %s2969_s26 }
  0xdd   : > { %p2978_p12 = scmp.lt.u32.totalorder %s2969_s26, %s3570_s11 }
  0xde   : > { %p2972_p10 = pnand %p2970_p5, %p4099_p1  ;;  %p2977_p2 = por %p2976_p13, %p2975_p3 }
  0xe0   : > { %p2973_p7 = pneg %p2972_p10  ;;  %p2979_p11 = por %p2978_p12, %p2977_p2 }
  0xe2   : > { %p2980_p4 = pnand %p2979_p11, %p2973_p7 }
  0xe4   : > { %2983 = shalt.err (!%p2980_p4)
}
  0xe5   : > { %s2984_s12 = scalar_lea.vmem %s3573_s20, 256  ;;  %s3144_s22 = smov [#allocation13]  }
  0xe6   : > { %p2985_p0 = scmp.ne.s32.totalorder %s3573_s20, %s2984_s12  ;;  %s2989_s9 = sshll.u32 %s3144_s22, 4  ;;  %s2990_s9 = int_to_ptr.vmem [resolvable:$false] %s2989_s9 }
  0xe7   : > { %s2991_s16 = scalar_lea.vmem %s2990_s9, 512  ;;  %p2992_p10 = scmp.lt.s32.totalorder %s3573_s20, %s2990_s9 }
  0xe8   : > { %p2987_p6 = pnand %p2985_p0, %p4099_p1  ;;  %p2993_p8 = scmp.lt.s32.totalorder %s2991_s16, %s2984_s12 }
  0xea   : > { %p2988_p5 = pneg %p2987_p6  ;;  %p2994_p3 = por %p2993_p8, %p2992_p10 }
  0xec   : > { %p2995_p13 = pnand %p2994_p3, %p2988_p5 }
  0xee   : > { %2998 = shalt.err (!%p2995_p13)
}
  0xef   : > { %2668 = dma.hbm_to_vmem [thread:$0]  (!%p4100_p9), %s3570_s11, 256, %s3573_s20, %s3577_s3, %s4102_s6, %s4102_s6, %s4101_s5  }
  0xf0   : > { %p4105_p1 = scmp.ne.s32.totalorder %s4074_s1, 0 }
  0xf1   : > { %s3607_s13 = sand.u32 (!%p4105_p1), 1, %s3109_s2   ;;  %p4106_p8 = scmp.ne.s32.totalorder (!%p4105_p1), %s4069_s0, 0 }
  0xf2   : > { %810 = sbr.rel (%p4105_p1) target bundleno = 3563 (0xdeb), region = 100  ;;  %s4029_s26 = sshll.u32 (!%p4105_p1), %s3607_s13, 1 }
  0xf3   : > { %s813_s17 = scalar_lea.sflag (!%p4105_p1), [#allocation5], %s3607_s13  ;;  %s3613_s7 = scalar_lea.vmem (!%p4105_p1), [#allocation4], %s4029_s26 }
  0xf9   : > { %3072 = dma.done.wait (%p4106_p8), %s813_s17, 32  }
  0xfa   : > { %3074 = vsyncadd (%p4106_p8), %s813_s17, 4294967264  ;;  %p4107_p9 = scmp.eq.s32.totalorder %s3309_s29, 0 }
  0xfc   : > { %3076 = dma.done.wait (%p4107_p9), [#allocation8], 32   ;;  %p4108_p7 = pmov %p4107_p9 }
  0xfd   : > { %s4109_s1 = sld [smem:[#allocation21_spill]]  ;;  %s4110_s5 = sld [smem:[#allocation31_spill]] }
  0xfe   : > { %3078 = vsyncadd (%p4108_p7), [#allocation8], 4294967264  ;;  %s829_s6 = sand.u32 1, %s3309_s29  }
  0xff   : > { %s830_s3 = scalar_lea.sflag [#allocation11], %s829_s6 }
 0x103   : > { %s831_s11 = sand.u32 1, %s4109_s1   ;;  %p4111_p2 = scmp.ne.s32.totalorder %s4110_s5, 0 }
 0x104   : > { %s3625_s20 = sshll.u32 %s831_s11, 4 }
 0x105   : > { %3080 = dma.done.wait (%p4111_p2), %s830_s3, 512  }
 0x106   : > { %3082 = vsyncadd (%p4111_p2), %s830_s3, 4294966784  ;;  %s848_s19 = scalar_lea.sflag [#allocation14], %s831_s11 }
 0x107   : > { %3084 = dma.done.wait (%p4111_p2), %s848_s19, 256  }
 0x108   : > { %3086 = vsyncadd (%p4111_p2), %s848_s19, 4294967040  ;;  %s4112_s29 = sld [smem:[#allocation27_spill]]  ;;  %s4113_s18 = sld [smem:[#allocation26_spill]] }
 0x109   : > { %s4114_s1 = sld [smem:[#allocation37_spill]]  ;;  %s4115_s19 = sld [smem:[#allocation41_spill]] }
 0x10a   : > { %s4117_s15 = sld [smem:[#allocation43_spill]]  ;;  %s4119_s27 = sld [smem:[#allocation46_spill]] }
 0x10b   : > { %s4123_s8 = sld [smem:[#allocation52_spill]]  ;;  %s4126_s21 = sld [smem:[#allocation55_spill]] }
 0x10c   : > { %s4127_s14 = sld [smem:[#allocation56_spill]]  ;;  %s4128_s4 = sshll.u32 %s3607_s13, 1 }
 0x10e   : > { %s2433_s12 = sshll.u32 %s4112_s29, 1  ;;  %p980_p11 = scmp.lt.s32.totalorder %s4113_s18, 1 }
 0x10f   : > { %p974_p12 = scmp.lt.s32.totalorder %s2433_s12, 3  ;;  %p2441_p4 = scmp.ne.s32.totalorder %s4113_s18, 0 }
 0x110   : > { %s3641_s22 = scalar_select %p980_p11, %s4113_s18, 1 }
 0x111   : > { %s4174_s12 = smov (!%p974_p12, %s2433_s12), 3  ;;  %vm1034_vm0 = vcmask (!%p2441_p4), 261120   ;;  %v2442_v21 = vld [vmem:[#allocation7] ss:$0 sm:$0xff] (!%p2441_p4)  ;;  %v2443_v23 = vld [vmem:[#allocation9] ss:$0 sm:$0xff] (!%p2441_p4) }
 0x112   : > { %s2434_s9 = sshll.u32 %s4174_s12, 3  ;;  %s2492_s6 = sshll.u32 %s3641_s22, 4 }
 0x113   : > { %s977_s5 = scalar_lea.vmem %s4114_s1, %s2434_s9  ;;  %s3650_s29 = scalar_lea.vmem %s4115_s19, %s2492_s6 }
 0x114   : > { %s3659_s12 = scalar_lea.vmem %s4117_s15, %s2492_s6  ;;  %s998_s25 = scalar_lea.vmem %s4119_s27, %s3641_s22  ;;  %v1030_v0 = vld [vmem:[%s977_s5] sm:$0xff] (!%p2441_p4)  ;;  %v1031_v1 = vld [vmem:[%s977_s5 + $0x8] sm:$0xff] (!%p2441_p4) }
 0x115   : > { %s1010_s16 = scalar_lea.vmem %s4123_s8, %s3641_s22  ;;  %s2494_s17 = sshll.u32 %s3641_s22, 5  ;;  %v1035_v2 = vsel (!%p2441_p4), %vm1034_vm0, %v1030_v0, 0.0  ;;  %v1038_v3 = vsel (!%p2441_p4), %vm1034_vm0, %v1031_v1, 0.0 }
 0x116   : > { %s4124_s27 = sld [smem:[#allocation53_spill]]  ;;  %s4125_s19 = sld [smem:[#allocation54_spill]]  ;;  %1036 = vadd.xlane.f32.xlu0 (!%p2441_p4), %v1035_v2 }
 0x117   : > { %s1021_s24 = scalar_lea.vmem %s4126_s21, %s3641_s22  ;;  %s1024_s15 = scalar_lea.vmem %s4127_s14, %s3641_s22 }
 0x118   : > { %s3705_s6 = scalar_lea.vmem [#allocation15], %s4128_s4  ;;  %1029 = sbr.rel (%p2441_p4) target bundleno = 595 (0x253), region = 128 }
 0x11a   : > { %1039 = vadd.xlane.f32.xlu0 (!%p2441_p4), %v1038_v3 }
 0x11c   : > { %s3689_s1 = scalar_lea.vmem %s4124_s27, %s2494_s17  ;;  %s1018_s2 = scalar_lea.vmem %s4125_s19, %s3641_s22 }
 0x1a3   : > { %v1037_v4 = vpop.xlane.xlu0 %1036 }
 0x1a4   : > { %v1042_v5 = vmul.f32 0.03125, %v1037_v4 }
 0x1a6   : > { %v1044_v6 = vsub.f32 %v1030_v0, %v1042_v5 }
 0x1a7   : > { %v1040_v7 = vpop.xlane.xlu0 %1039 }
 0x1a8   : > { %v1043_v8 = vmul.f32 0.03125, %v1040_v7  ;;  %v1046_v9 = vmul.f32 %v1044_v6, %v1044_v6 }
 0x1aa   : > { %v1045_v10 = vsub.f32 %v1031_v1, %v1043_v8  ;;  %v1048_v11 = vsel %vm1034_vm0, %v1046_v9, 0.0 }
 0x1ab   : > { %1049 = vadd.xlane.f32.xlu1 %v1048_v11 }
 0x1ac   : > { %v1047_v12 = vmul.f32 %v1045_v10, %v1045_v10 }
 0x1ae   : > { %v1051_v13 = vsel %vm1034_vm0, %v1047_v12, 0.0 }
 0x1af   : > { %1052 = vadd.xlane.f32.xlu1 %v1051_v13 }
 0x238   : > { %v1050_v14 = vpop.xlane.xlu1 %1049 }
 0x239   : > { %v1054_v15 = vmul.f32 0.03125, %v1050_v14 }
 0x23b   : > { %v1056_v16 = vadd.f32 1e-12, %v1054_v15 }
 0x23c   : > { %v1053_v17 = vpop.xlane.xlu1 %1052 }
 0x23d   : > { %2777 = vrsqrt.f32 %v1056_v16  ;;  %v1055_v18 = vmul.f32 0.03125, %v1053_v17 }
 0x23f   : > { %v1057_v19 = vadd.f32 1e-12, %v1055_v18 }
 0x241   : > { %2779 = vrsqrt.f32 %v1057_v19 }
 0x247   : > { %v2778_v20 = vpop.eup %2777 }
 0x248   : > { %v1060_v22 = vmul.f32 %v2778_v20, %v1044_v6 }
 0x24a   : > { %v1068_v24 = vmul.f32 %v2442_v21, %v1060_v22 }
 0x24b   : > { %v2780_v25 = vpop.eup %2779 }
 0x24c   : > { %v1076_v26 = vadd.f32 %v2443_v23, %v1068_v24  ;;  %v1061_v27 = vmul.f32 %v2780_v25, %v1045_v10 }
 0x24e   : > { %1078 = vst.msk [vmem:[#allocation2] sm:$0xff] %vm1034_vm0, %v1076_v26  ;;  %v1069_v28 = vmul.f32 %v2442_v21, %v1061_v27 }
 0x250   : > { %v1077_v29 = vadd.f32 %v2443_v23, %v1069_v28 }
 0x252   : > { %1079 = vst.msk [vmem:[#allocation2 + $0x8] sm:$0xff] %vm1034_vm0, %v1077_v29 }
 0x253 PF: > { %v2781_v30 = vld [vmem:[%s3659_s12] sm:$0xff]   ;;  %v3145_v31 = vmov 0.0   ;;  %v2783_v33 = vld [vmem:[%s3659_s12 + $0x8] sm:$0xff]   ;;  %vm3146_vm1 = vmmov 0   ;;  %vm1106_vm2 = vcmask 261120   ;;  %s4129_s18 = scalar_lea.vmem [#allocation10], %s3625_s20 }
 0x254   : > { %2539 = vmatprep.subr.bf16.mxu1 %v3145_v31  ;;  %2531 = vmatprep.subr.bf16.mxu0 %v3145_v31  ;;  %v2782_v32 = vld [vmem:[%s3650_s29] sm:$0xff]   ;;  %v2784_v36 = vld [vmem:[%s3650_s29 + $0x8] sm:$0xff]   ;;  %s4130_s5 = smov %s4129_s18  ;;  %s4131_s9 = sld [smem:[#allocation44_spill]]  ;;  %vm1301_vm3 = vcmask 130048   ;;  %vm1422_vm4 = vcmask 1043456   ;;  %vm1394_vm5 = vcmask 64512  }
 0x255   : > { %2540 = vmatpush3.bf16.msra.mxu1 %v2781_v30  ;;  %2543 = vmatprep.mubr.msk.bf16.mxu1 %vm3146_vm1, %v3145_v31  ;;  %v3722_v34 = vld [vmem:[#allocation2] sm:$0xff]  ;;  %v2786_v39 = vld [vmem:[%s4130_s5 + $0x8] sm:$0xff]   ;;  %s4133_s27 = sld [smem:[#allocation42_spill]]  ;;  %s3147_s3 = smov 112   ;;  %v3786_v9 = vld [vmem:[%s3613_s7] ss:$0 sm:$0xff] }
 0x256   : > { %2541 = vmatprep.subr.bf16.mxu1 %v3145_v31  ;;  %2532 = vmatpush3.bf16.msra.mxu0 %v2782_v32  ;;  %v2785_v38 = vld [vmem:[%s4129_s18] sm:$0xff]   ;;  %v3789_v11 = vld [vmem:[%s3613_s7 + $0x1] ss:$0 sm:$0xff]  ;;  %s3148_s21 = smov 16   ;;  %vm1745_vm6 = vcmask 261248   ;;  %s4138_s14 = sld [smem:[#allocation48_spill]] }
 0x257   : > { %2533 = vmatprep.subr.bf16.mxu0 %v3145_v31  ;;  %2535 = vmatprep.mubr.msk.bf16.mxu0 %vm3146_vm1, %v3145_v31  ;;  %v2452_v59 = vld [vmem:[%s998_s25] ss:$0 sm:$0xff]  ;;  %s4136_s25 = scalar_lea.vmem [#allocation12], %s3625_s20  ;;  %s4140_s18 = scalar_lea.vmem [#allocation13], %s3625_s20  ;;  %vm1988_vm7 = vcmask 523264   ;;  %vm2084_vm8 = vcmask 1041409  }
 0x258   : > { %s4137_s7 = smov %s4136_s25  ;;  %s4141_s5 = smov %s4140_s18  ;;  %vm2087_vm9 = vcmask 254976  }
 0x259   : > { %v3724_v35 = vld [vmem:[#allocation2 + $0x8] sm:$0xff]  ;;  %2542 = vmatpush3.bf16.msra.mxu1 %v2783_v33  ;;  %s4142_s20 = sld [smem:[#allocation49_spill]]  ;;  %s4144_s28 = sld [smem:[#allocation50_spill]] }
 0x25a   : > { %v1082_v37 = vpack.c.bf16 %v3724_v35, %v3722_v34  ;;  %2534 = vmatpush3.bf16.msra.mxu0 %v2784_v36  ;;  %2555 = vmatprep.subr.bf16.mxu1 %v3145_v31  ;;  %s4132_s8 = scalar_lea.vmem %s4131_s9, %s3641_s22  ;;  %p4152_p6 = scmp.ne.s32.totalorder %s4092_s30, 0 }
 0x25b   : > { %2547 = vmatprep.subr.bf16.mxu0 %v3145_v31  ;;  %v2448_v40 = vld [vmem:[%s4132_s8] ss:$0 sm:$0xff]  ;;  %s4134_s11 = scalar_lea.vmem %s4133_s27, %s3641_s22  ;;  %s3149_s12 = smov [#allocation15]  }
 0x25c   : > { %2544 = vmatmul.mubr.msk.bf16.vlgmr.msra.gmra.mrb[0].mxu1 %vm1106_vm2, %v1082_v37  ;;  %v2444_v41 = vld [vmem:[%s4134_s11] ss:$0 sm:$0xff]  ;;  %s4139_s4 = scalar_lea.vmem %s4138_s14, %s3641_s22 }
 0x25d   : > { %2536 = vmatmul.mubr.msk.bf16.vlgmr.msra.gmra.mrb[0].mxu0 %vm1106_vm2, %v1082_v37  ;;  %2557 = vmatprep.mubr.msk.bf16.mxu1 %vm3146_vm1, %v3145_v31 }
 0x25e   : > { %2548 = vmatpush3.bf16.msra.mxu0 %v2785_v38  ;;  %2551 = vmatprep.mubr.msk.bf16.mxu0 %vm3146_vm1, %v3145_v31 }
 0x25f   : > { %2549 = vmatprep.subr.bf16.mxu0 %v3145_v31  ;;  %s4143_s9 = scalar_lea.vmem %s4142_s20, %s3641_s22  ;;  %s4145_s27 = scalar_lea.vmem %s4144_s28, %s3641_s22 }
 0x260   : > { %s3003_s20 = sshll.u32 %s3149_s12, 4  ;;  %s3004_s20 = int_to_ptr.vmem [resolvable:$false] %s3003_s20 }
 0x262   : > { %2550 = vmatpush3.bf16.msra.mxu0 %v2786_v39 }
 0x263   : > { %2561 = vmatprep.subr.bf16.mxu0 %v3145_v31 }
 0x265   : > { %2552 = vmatmul.mubr.msk.bf16.vlgmr.msra.gmra.mrb[4].mxu0 %vm1106_vm2, %v1082_v37 }
 0x266   : > { %2563 = vmatprep.mubr.msk.bf16.mxu0 %vm3146_vm1, %v3145_v31 }
 0x32f   : > { %v1208_v42 = vpop.f32.mrb[0].mxu1 }
 0x330   : > { %v1209_v43 = vadd.f32 %v2448_v40, %v1208_v42  ;;  %v2545_v44 = vpop.f32.mrb[1].mxu1  ;;  %v1144_v45 = vpop.f32.mrb[0].mxu0 }
 0x331   : > { %v1211_v46 = vpop.f32.mrb[2].mxu1  ;;  %v1145_v47 = vadd.f32 %v2444_v41, %v1144_v45  ;;  %v2537_v48 = vpop.f32.mrb[1].mxu0 }
 0x332   : > { %v1297_v49 = vpack.c.bf16 %v1209_v43, %v1209_v43  ;;  %v1212_v50 = vadd.f32 %v2448_v40, %v1211_v46  ;;  %v2546_v51 = vpop.f32.mrb[3].mxu1  ;;  %v1147_v52 = vpop.f32.mrb[2].mxu0 }
 0x333   : > { %v2538_v53 = vpop.f32.mrb[3].mxu0  ;;  %v1293_v56 = vmul.f32 0.25, %v1145_v47  ;;  %v1148_v57 = vadd.f32 %v2444_v41, %v1147_v52 }
 0x334   : > { %v1306_v54 = vsel %vm1301_vm3, %v1297_v49, 0  ;;  %v1298_v55 = vpack.c.bf16 %v1212_v50, %v1212_v50 }
 0x335   : > { %2556 = vmatpush3.bf16.xpose.msra.mxu1 %v1306_v54  ;;  %v1295_v60 = vpack.c.bf16 %v1293_v56, %v1293_v56  ;;  %v1294_v61 = vmul.f32 0.25, %v1148_v57 }
 0x336   : > { %v1352_v58 = vsel %vm1301_vm3, %v1298_v55, 0  ;;  %1570 = vrot.lane.b32.xlu1 %v1298_v55, %s3147_s3  ;;  %2567 = vmatprep.subr.bf16.mxu1 %v3145_v31 }
 0x337   : > { %2562 = vmatpush3.bf16.xpose.msra.mxu0 %v1352_v58  ;;  %v1296_v5 = vpack.c.bf16 %v1294_v61, %v1294_v61 }
 0x338   : > { %v1272_v62 = vpop.f32.mrb[4].mxu0  ;;  %2573 = vmatprep.subr.bf16.mxu0 %v3145_v31 }
 0x339   : > { %v1273_v63 = vadd.f32 %v2452_v59, %v1272_v62  ;;  %v2553_v0 = vpop.f32.mrb[5].mxu0 }
 0x33a   : > { %v1275_v1 = vpop.f32.mrb[6].mxu0 }
 0x33b   : > { %v3769_v2 = vpack.c.bf16 %v1273_v63, %v1273_v63  ;;  %v1276_v3 = vadd.f32 %v2452_v59, %v1275_v1  ;;  %v2554_v4 = vpop.f32.mrb[7].mxu0 }
 0x33c   : > { %2558 = vmatmul.mubr.msk.bf16.vlgmr.msra.gmra.mrb[4].mxu1 %vm1301_vm3, %v1295_v60 }
 0x33d   : > { %v1424_v6 = vsel %vm1422_vm4, %v3769_v2, 0  ;;  %v3774_v7 = vpack.c.bf16 %v1276_v3, %v1276_v3  ;;  %2569 = vmatprep.mubr.msk.bf16.mxu1 %vm3146_vm1, %v3145_v31 }
 0x33e   : > { %2564 = vmatmul.mubr.msk.bf16.vlgmr.msra.gmra.mrb[8].mxu0 %vm1301_vm3, %v1296_v5  ;;  %2568 = vmatpush3.bf16.msra.mxu1 %v1424_v6 }
 0x33f   : > { %v1470_v8 = vsel %vm1422_vm4, %v3774_v7, 0  ;;  %2579 = vmatprep.subr.bf16.mxu1 %v3145_v31  ;;  %2575 = vmatprep.mubr.msk.bf16.mxu0 %vm3146_vm1, %v3145_v31 }
 0x340   : > { %2574 = vmatpush3.bf16.msra.mxu0 %v1470_v8 }
 0x341   : > { %2585 = vmatprep.subr.bf16.mxu0 %v3145_v31 }
 0x3a8   : > { %v1571_v36 = vpop.permute.xlu1 %1570 }
 0x3a9   : > { %v1576_v47 = vsel %vm1301_vm3, %v1571_v36, 0 }
 0x40f   : > { %v1342_v10 = vpop.f32.mrb[4].mxu1 }
 0x410   : > { %v1343_v12 = vadd.f32 %v3786_v9, %v1342_v10  ;;  %v2559_v13 = vpop.f32.mrb[5].mxu1 }
 0x411   : > { %v1345_v14 = vpop.f32.mrb[6].mxu1  ;;  %v1388_v15 = vpop.f32.mrb[8].mxu0 }
 0x412   : > { %v1389_v16 = vadd.f32 %v3789_v11, %v1388_v15  ;;  %v2560_v17 = vpop.f32.mrb[7].mxu1  ;;  %v2565_v18 = vpop.f32.mrb[9].mxu0  ;;  %v1395_v19 = vsel %vm1394_vm5, %v1343_v12, -inf }
 0x413   : > { %1396 = vmax.xlane.f32.xlu0 %v1395_v19  ;;  %v1391_v20 = vpop.f32.mrb[10].mxu0 }
 0x414   : > { %v2566_v21 = vpop.f32.mrb[11].mxu0  ;;  %v1398_v22 = vsel %vm1394_vm5, %v1389_v16, -inf }
 0x417   : > { %1399 = vmax.xlane.f32.xlu0 %v1398_v22 }
 0x42d   : > { %1518 = vrot.lane.b32.xlu0 %v1297_v49, %s3147_s3 }
 0x4a0   : > { %v1397_v23 = vpop.xlane.xlu0 %1396 }
 0x4a1   : > { %v1401_v24 = vsub.f32 %v1343_v12, %v1397_v23 }
 0x4a3   : > { %v1403_v25 = vmul.f32 1.442695, %v1401_v24 }
 0x4a4   : > { %v1400_v26 = vpop.xlane.xlu0 %1399 }
 0x4a5   : > { %2795 = vpow2.f32 %v1403_v25  ;;  %v1402_v27 = vsub.f32 %v1389_v16, %v1400_v26 }
 0x4a7   : > { %v1405_v28 = vmul.f32 1.442695, %v1402_v27 }
 0x4a8   : > { %v1519_v41 = vpop.permute.xlu0 %1518 }
 0x4a9   : > { %2797 = vpow2.f32 %v1405_v28  ;;  %v1524_v44 = vsel %vm1301_vm3, %v1519_v41, 0 }
 0x4af   : > { %v2796_v29 = vpop.eup %2795 }
 0x4b0   : > { %v1407_v30 = vsel %vm1394_vm5, %v2796_v29, 0.0 }
 0x4b1   : > { %1408 = vadd.xlane.f32.xlu1 %v1407_v30  ;;  %v2788_v30 = vld [vmem:[%s4137_s7 + $0x8] sm:$0xff]  }
 0x4b3   : > { %v2798_v32 = vpop.eup %2797 }
 0x4b4   : > { %v1410_v33 = vsel %vm1394_vm5, %v2798_v32, 0.0 }
 0x4b5   : > { %1411 = vadd.xlane.f32.xlu1 %v1410_v33 }
 0x4c6   : > { %1515 = vrot.lane.b32.xlu1 %v1295_v60, %s3147_s3 }
 0x4ca   : > { %1567 = vrot.lane.b32.xlu1 %v1296_v5, %s3147_s3 }
 0x53e   : > { %v1409_v37 = vpop.xlane.xlu1 %1408 }
 0x53f   : > { %2799 = vrcp.f32 %v1409_v37 }
 0x542   : > { %v1412_v38 = vpop.xlane.xlu1 %1411 }
 0x543   : > { %2801 = vrcp.f32 %v1412_v38 }
 0x546   : > { %v1516_v48 = vpop.permute.xlu1 %1515 }
 0x549   : > { %v2800_v39 = vpop.eup %2799 }
 0x54a   : > { %v1415_v40 = vmul.f32 %v2800_v39, %v2796_v29  ;;  %v1568_v49 = vpop.permute.xlu1 %1567  ;;  %v2787_v29 = vld [vmem:[%s4136_s25] sm:$0xff]  }
 0x54c   : > { %v1417_v42 = vpack.c.bf16 %v1415_v40, %v1415_v40 }
 0x54d   : > { %v2802_v43 = vpop.eup %2801 }
 0x54e   : > { %v1416_v45 = vmul.f32 %v2802_v43, %v2798_v32  ;;  %2570 = vmatmul.mubr.msk.bf16.vlgmr.msra.gmra.mrb[8].mxu1 %vm1394_vm5, %v1417_v42 }
 0x54f   : > { %2580 = vmatpush3.bf16.xpose.msra.mxu1 %v1524_v44  ;;  %2581 = vmatprep.mubr.msk.bf16.mxu1 %vm3146_vm1, %v3145_v31 }
 0x550   : > { %v1418_v46 = vpack.c.bf16 %v1416_v45, %v1416_v45  ;;  %2591 = vmatprep.subr.bf16.mxu1 %v3145_v31  ;;  %v2466_v45 = vld [vmem:[%s4139_s4] ss:$0 sm:$0xff]  ;;  %s2103_s4 = sshll.u32 %s3705_s6, 4  ;;  %s3913_s4 = int_to_ptr.vmem [resolvable:$true] %s2103_s4 }
 0x551   : > { %s2999_s29 = scalar_lea.vmem %s3913_s4, 32  ;;  %p3006_p3 = scmp.lt.s32.totalorder %s3913_s4, %s3004_s20 }
 0x552   : > { %2576 = vmatmul.mubr.msk.bf16.vlgmr.msra.gmra.mrb[12].mxu0 %vm1394_vm5, %v1418_v46  ;;  %p3000_p0 = scmp.ne.s32.totalorder %s3913_s4, %s2999_s29 }
 0x553   : > { %2586 = vmatpush3.bf16.xpose.msra.mxu0 %v1576_v47  ;;  %2587 = vmatprep.mubr.msk.bf16.mxu0 %vm3146_vm1, %v3145_v31 }
 0x554   : > { %2597 = vmatprep.subr.bf16.mxu0 %v3145_v31  ;;  %p3001_p5 = pnand %p3000_p0, %p4152_p6 }
 0x556   : > { %2582 = vmatmul.mubr.msk.bf16.vlgmr.msra.gmra.mrb[12].mxu1 %vm1301_vm3, %v1516_v48  ;;  %p3002_p10 = pneg %p3001_p5 }
 0x557   : > { %2593 = vmatprep.mubr.msk.bf16.mxu1 %vm3146_vm1, %v3145_v31 }
 0x55a   : > { %2588 = vmatmul.mubr.msk.bf16.vlgmr.msra.gmra.mrb[16].mxu0 %vm1301_vm3, %v1568_v49 }
 0x55b   : > { %2599 = vmatprep.mubr.msk.bf16.mxu0 %vm3146_vm1, %v3145_v31 }
 0x621   : > { %v1460_v50 = vpop.f32.mrb[8].mxu1 }
 0x622   : > { %v2571_v51 = vpop.f32.mrb[9].mxu1 }
 0x623   : > { %v1463_v52 = vpop.f32.mrb[10].mxu1 }
 0x624   : > { %v2572_v53 = vpop.f32.mrb[11].mxu1 }
 0x625   : > { %v1506_v54 = vpop.f32.mrb[12].mxu0 }
 0x626   : > { %v1512_v55 = vpack.c.bf16 %v1506_v54, %v1460_v50  ;;  %v2577_v56 = vpop.f32.mrb[13].mxu0 }
 0x627   : > { %v1509_v57 = vpop.f32.mrb[14].mxu0 }
 0x628   : > { %1513 = vst.msk [vmem:[#allocation3] sm:$0xff] %vm1301_vm3, %v1512_v55  ;;  %v2578_v58 = vpop.f32.mrb[15].mxu0 }
 0x629   : > { %v1560_v59 = vpop.f32.mrb[12].mxu1 }
 0x62a   : > { %v1561_v60 = vadd.f32 %v3786_v9, %v1560_v59  ;;  %v2583_v61 = vpop.f32.mrb[13].mxu1 }
 0x62b   : > { %v1563_v62 = vpop.f32.mrb[14].mxu1 }
 0x62c   : > { %v2584_v63 = vpop.f32.mrb[15].mxu1  ;;  %v1618_v0 = vsel %vm1394_vm5, %v1561_v60, -inf }
 0x62d   : > { %1619 = vmax.xlane.f32.xlu0 %v1618_v0  ;;  %v1612_v1 = vpop.f32.mrb[16].mxu0 }
 0x62e   : > { %v1613_v3 = vadd.f32 %v3789_v11, %v1612_v1  ;;  %v2589_v4 = vpop.f32.mrb[17].mxu0  ;;  %v2790_v1 = vld [vmem:[%s4141_s5 + $0x8] sm:$0xff]   ;;  %s2090_s5 = scalar_lea.sflag [#allocation6], %s3607_s13 }
 0x62f   : > { %v1615_v5 = vpop.f32.mrb[18].mxu0 }
 0x630   : > { %v2590_v6 = vpop.f32.mrb[19].mxu0  ;;  %v1621_v8 = vsel %vm1394_vm5, %v1613_v3, -inf }
 0x631   : > { %1622 = vmax.xlane.f32.xlu1 %v1621_v8 }
 0x642   : > { %1692 = vrot.lane.b32.xlu1 %v3774_v7, %s3147_s3 }
 0x6ba   : > { %v1620_v10 = vpop.xlane.xlu0 %1619 }
 0x6bb   : > { %v1624_v9 = vsub.f32 %v1561_v60, %v1620_v10 }
 0x6bd   : > { %v1626_v12 = vmul.f32 1.442695, %v1624_v9 }
 0x6be   : > { %v1623_v13 = vpop.xlane.xlu1 %1622 }
 0x6bf   : > { %2803 = vpow2.f32 %v1626_v12  ;;  %v1625_v14 = vsub.f32 %v1613_v3, %v1623_v13  ;;  %v2470_v13 = vld [vmem:[%s4143_s9] ss:$0 sm:$0xff]  ;;  %s3005_s9 = scalar_lea.vmem %s3004_s20, 64 }
 0x6c0   : > { %p3007_p13 = scmp.lt.s32.totalorder %s3005_s9, %s2999_s29 }
 0x6c1   : > { %v1628_v15 = vmul.f32 1.442695, %v1625_v14 }
 0x6c2   : > { %v1693_v16 = vpop.permute.xlu1 %1692  ;;  %p3008_p1 = por %p3007_p13, %p3006_p3 }
 0x6c3   : > { %2805 = vpow2.f32 %v1628_v15  ;;  %v1698_v11 = vsel %vm1422_vm4, %v1693_v16, 0 }
 0x6c4   : > { %2598 = vmatpush3.bf16.msra.mxu0 %v1698_v11  ;;  %v2471_v11 = vld [vmem:[%s4145_s27] ss:$0 sm:$0xff]  ;;  %p3009_p8 = pnand %p3008_p1, %p3002_p10 }
 0x6c5   : > { %2611 = vmatprep.subr.bf16.mxu0 %v3145_v31 }
 0x6c9   : > { %v2804_v17 = vpop.eup %2803 }
 0x6ca   : > { %v1630_v18 = vsel %vm1394_vm5, %v2804_v17, 0.0 }
 0x6cb   : > { %1631 = vadd.xlane.f32.xlu0 %v1630_v18 }
 0x6cd   : > { %v2806_v19 = vpop.eup %2805 }
 0x6ce   : > { %v1633_v7 = vsel %vm1394_vm5, %v2806_v19, 0.0 }
 0x6cf   : > { %1634 = vadd.xlane.f32.xlu0 %v1633_v7 }
 0x6e5   : > { %1643 = vrot.lane.b32.xlu0 %v3769_v2, %s3147_s3 }
 0x758   : > { %v1632_v20 = vpop.xlane.xlu0 %1631 }
 0x759   : > { %2807 = vrcp.f32 %v1632_v20  ;;  %v2791_v20 = vld [vmem:[%s3689_s1] sm:$0xff]  }
 0x75c   : > { %v1635_v21 = vpop.xlane.xlu0 %1634 }
 0x75d   : > { %2809 = vrcp.f32 %v1635_v21  ;;  %v2792_v21 = vld [vmem:[%s3689_s1 + $0x8] sm:$0xff]  }
 0x760   : > { %v1644_v22 = vpop.permute.xlu0 %1643 }
 0x761   : > { %v1649_v23 = vsel %vm1422_vm4, %v1644_v22, 0  ;;  %v2793_v22 = vld [vmem:[%s3689_s1 + $0x10] sm:$0xff]  }
 0x762   : > { %2592 = vmatpush3.bf16.msra.mxu1 %v1649_v23  ;;  %v2794_v23 = vld [vmem:[%s3689_s1 + $0x18] sm:$0xff]  }
 0x763   : > { %v2808_v24 = vpop.eup %2807  ;;  %2603 = vmatprep.subr.bf16.mxu1 %v3145_v31 }
 0x764   : > { %v1638_v25 = vmul.f32 %v2808_v24, %v2804_v17  ;;  %v2472_v24 = vld [vmem:[%s1010_s16] ss:$0 sm:$0xff] }
 0x766   : > { %v1640_v26 = vpack.c.bf16 %v1638_v25, %v1638_v25 }
 0x767   : > { %v2810_v27 = vpop.eup %2809 }
 0x768   : > { %v1639_v28 = vmul.f32 %v2810_v27, %v2806_v19  ;;  %2594 = vmatmul.mubr.msk.bf16.vlgmr.msra.gmra.mrb[16].mxu1 %vm1394_vm5, %v1640_v26 }
 0x769   : > { %2607 = vmatprep.mubr.msk.bf16.mxu1 %vm3146_vm1, %v3145_v31  ;;  %2604 = vmatpush3.bf16.msra.mxu1 %v2787_v29 }
 0x76a   : > { %v1641_v2 = vpack.c.bf16 %v1639_v28, %v1639_v28  ;;  %2605 = vmatprep.subr.bf16.mxu1 %v3145_v31 }
 0x76c   : > { %2600 = vmatmul.mubr.msk.bf16.vlgmr.msra.gmra.mrb[20].mxu0 %vm1394_vm5, %v1641_v2 }
 0x76d   : > { %2615 = vmatprep.mubr.msk.bf16.mxu0 %vm3146_vm1, %v3145_v31  ;;  %2606 = vmatpush3.bf16.msra.mxu1 %v2788_v30 }
 0x76e   : > { %2619 = vmatprep.subr.bf16.mxu1 %v3145_v31 }
 0x83b   : > { %v1685_v32 = vpop.f32.mrb[16].mxu1 }
 0x83c   : > { %v2595_v33 = vpop.f32.mrb[17].mxu1 }
 0x83d   : > { %v1688_v36 = vpop.f32.mrb[18].mxu1 }
 0x83e   : > { %v2596_v37 = vpop.f32.mrb[19].mxu1 }
 0x83f   : > { %v1734_v38 = vpop.f32.mrb[20].mxu0 }
 0x840   : > { %v1740_v39 = vpack.c.bf16 %v1734_v38, %v1685_v32  ;;  %v2601_v40 = vpop.f32.mrb[21].mxu0 }
 0x841   : > { %v1737_v41 = vpop.f32.mrb[22].mxu0 }
 0x842   : > { %1742 = vrot.lane.b32.xlu1 %v1740_v39, %s3148_s21  ;;  %v2602_v42 = vpop.f32.mrb[23].mxu0 }
 0x8b4   : > { %v1743_v43 = vpop.permute.xlu1 %1742 }
 0x8b5   : > { %1746 = vst.msk [vmem:[#allocation3] sm:$0xff] %vm1745_vm6, %v1743_v43 }
 0x8bc   : > { %v1747_v44 = vld [vmem:[#allocation3] sm:$0xff] }
 0x8bd   : > { %2608 = vmatmul.mubr.msk.bf16.vlgmr.msra.gmra.mrb[20].mxu1 %vm1106_vm2, %v1747_v44 }
 0x8be   : > { %2627 = vmatprep.mubr.msk.bf16.mxu1 %vm3146_vm1, %v3145_v31  ;;  %2620 = vmatpush3.bf16.msra.mxu1 %v2791_v20 }
 0x8bf   : > { %2621 = vmatprep.subr.bf16.mxu1 %v3145_v31 }
 0x8c2   : > { %2622 = vmatpush3.bf16.msra.mxu1 %v2792_v21 }
 0x8c3   : > { %2623 = vmatprep.subr.bf16.mxu1 %v3145_v31 }
 0x8c6   : > { %2624 = vmatpush3.bf16.msra.mxu1 %v2793_v22 }
 0x8c7   : > { %2625 = vmatprep.subr.bf16.mxu1 %v3145_v31 }
 0x8ca   : > { %2626 = vmatpush3.bf16.msra.mxu1 %v2794_v23 }
 0x990   : > { %v1808_v46 = vpop.f32.mrb[20].mxu1 }
 0x991   : > { %v1809_v47 = vadd.f32 %v2466_v45, %v1808_v46  ;;  %v2609_v48 = vpop.f32.mrb[21].mxu1 }
 0x992   : > { %v1811_v49 = vpop.f32.mrb[22].mxu1 }
 0x993   : > { %v1812_v50 = vadd.f32 %v2466_v45, %v1811_v49  ;;  %v2610_v51 = vpop.f32.mrb[23].mxu1  ;;  %v1815_v52 = vadd.f32 %v1809_v47, %v3722_v34 }
 0x994   : > { %v2476_v51 = vld [vmem:[%s1018_s2] ss:$0 sm:$0xff]  ;;  %s4148_s2 = sld [smem:[#allocation27_spill]] }
 0x995   : > { %v1819_v53 = vsel %vm1106_vm2, %v1815_v52, 0.0  ;;  %v1816_v54 = vadd.f32 %v1812_v50, %v3724_v35  ;;  %v2789_v35 = vld [vmem:[%s4140_s18] sm:$0xff]  }
 0x996   : > { %1820 = vadd.xlane.f32.xlu1 %v1819_v53  ;;  %2612 = vmatpush3.bf16.msra.mxu0 %v2789_v35 }
 0x997   : > { %v1822_v55 = vsel %vm1106_vm2, %v1816_v54, 0.0  ;;  %2613 = vmatprep.subr.bf16.mxu0 %v3145_v31 }
 0x998   : > { %1823 = vadd.xlane.f32.xlu0 %v1822_v55 }
 0x99a   : > { %2614 = vmatpush3.bf16.msra.mxu0 %v2790_v1  ;;  %s2485_s14 = sshll.u32 %s4148_s2, 5 }
 0xa23   : > { %v1821_v56 = vpop.xlane.xlu1 %1820 }
 0xa24   : > { %v1826_v57 = vmul.f32 0.03125, %v1821_v56 }
 0xa25   : > { %v1824_v58 = vpop.xlane.xlu0 %1823 }
 0xa26   : > { %v1828_v59 = vsub.f32 %v1815_v52, %v1826_v57  ;;  %v1827_v60 = vmul.f32 0.03125, %v1824_v58 }
 0xa28   : > { %v1829_v61 = vsub.f32 %v1816_v54, %v1827_v60  ;;  %v1830_v62 = vmul.f32 %v1828_v59, %v1828_v59 }
 0xa2a   : > { %v1832_v63 = vsel %vm1106_vm2, %v1830_v62, 0.0  ;;  %v1831_v34 = vmul.f32 %v1829_v61, %v1829_v61 }
 0xa2b   : > { %1833 = vadd.xlane.f32.xlu0 %v1832_v63 }
 0xa2c   : > { %v1835_v0 = vsel %vm1106_vm2, %v1831_v34, 0.0 }
 0xa2f   : > { %1836 = vadd.xlane.f32.xlu0 %v1835_v0 }
 0xab8   : > { %v1834_v3 = vpop.xlane.xlu0 %1833 }
 0xab9   : > { %v1838_v4 = vmul.f32 0.03125, %v1834_v3 }
 0xabb   : > { %v1840_v5 = vadd.f32 1e-12, %v1838_v4 }
 0xabc   : > { %v1837_v6 = vpop.xlane.xlu0 %1836 }
 0xabd   : > { %2811 = vrsqrt.f32 %v1840_v5  ;;  %v1839_v8 = vmul.f32 0.03125, %v1837_v6 }
 0xabf   : > { %v1841_v10 = vadd.f32 1e-12, %v1839_v8 }
 0xac1   : > { %2813 = vrsqrt.f32 %v1841_v10 }
 0xac7   : > { %v2812_v9 = vpop.eup %2811 }
 0xac8   : > { %v1844_v12 = vmul.f32 %v2812_v9, %v1828_v59 }
 0xaca   : > { %v1852_v15 = vmul.f32 %v2470_v13, %v1844_v12 }
 0xacb   : > { %v2814_v14 = vpop.eup %2813 }
 0xacc   : > { %v1845_v16 = vmul.f32 %v2814_v14, %v1829_v61  ;;  %v1860_v18 = vadd.f32 %v2471_v11, %v1852_v15 }
 0xace   : > { %v1853_v17 = vmul.f32 %v2470_v13, %v1845_v16  ;;  %v2482_v16 = vld [vmem:[%s1021_s24] ss:$0 sm:$0xff] }
 0xad0   : > { %v1861_v19 = vadd.f32 %v2471_v11, %v1853_v17 }
 0xad2   : > { %v1862_v7 = vpack.c.bf16 %v1861_v19, %v1860_v18 }
 0xad4   : > { %2616 = vmatmul.mubr.msk.bf16.vlgmr.msra.gmra.mrb[24].mxu0 %vm1106_vm2, %v1862_v7 }
 0xba7   : > { %v1923_v25 = vpop.f32.mrb[24].mxu0 }
 0xba8   : > { %v1924_v26 = vadd.f32 %v2472_v24, %v1923_v25  ;;  %v2617_v27 = vpop.f32.mrb[25].mxu0 }
 0xba9   : > { %v1926_v28 = vpop.f32.mrb[26].mxu0 }
 0xbaa   : > { %v1932_v2 = vmul.f32 0.044715, %v1924_v26  ;;  %v1927_v29 = vadd.f32 %v2472_v24, %v1926_v28  ;;  %v2618_v30 = vpop.f32.mrb[27].mxu0  ;;  %v1930_v45 = vmul.f32 0.5, %v1924_v26 }
 0xbac   : > { %v1934_v32 = vmul.f32 %v1932_v2, %v1924_v26  ;;  %v1933_v33 = vmul.f32 0.044715, %v1927_v29  ;;  %v1931_v46 = vmul.f32 0.5, %v1927_v29 }
 0xbae   : > { %v1936_v36 = vmul.f32 %v1934_v32, %v1924_v26  ;;  %v1935_v37 = vmul.f32 %v1933_v33, %v1927_v29 }
 0xbb0   : > { %v1938_v38 = vadd.f32 %v1936_v36, %v1924_v26  ;;  %v1937_v39 = vmul.f32 %v1935_v37, %v1927_v29 }
 0xbb2   : > { %v1940_v31 = vmul.f32 0.7978846, %v1938_v38  ;;  %v1939_v40 = vadd.f32 %v1937_v39, %v1927_v29 }
 0xbb4   : > { %2815 = vtanh.f32 %v1940_v31  ;;  %v1941_v41 = vmul.f32 0.7978846, %v1939_v40 }
 0xbb6   : > { %2817 = vtanh.f32 %v1941_v41 }
 0xbbe   : > { %v2816_v42 = vpop.eup %2815 }
 0xbbf   : > { %v1944_v43 = vadd.f32 1.0, %v2816_v42 }
 0xbc0   : > { %v2818_v44 = vpop.eup %2817 }
 0xbc1   : > { %v1945_v47 = vadd.f32 1.0, %v2818_v44  ;;  %v1946_v48 = vmul.f32 %v1944_v43, %v1930_v45 }
 0xbc3   : > { %v1947_v49 = vmul.f32 %v1945_v47, %v1931_v46 }
 0xbc5   : > { %v1948_v50 = vpack.c.bf16 %v1947_v49, %v1946_v48 }
 0xbc7   : > { %2628 = vmatmul.mubr.msk.bf16.vlgmr.msra.gmra.mrb[24].mxu1 %vm1988_vm7, %v1948_v50 }
 0xc9a   : > { %v2026_v52 = vpop.f32.mrb[24].mxu1 }
 0xc9b   : > { %v2027_v53 = vadd.f32 %v2476_v51, %v2026_v52  ;;  %v2629_v54 = vpop.f32.mrb[25].mxu1 }
 0xc9c   : > { %v2029_v55 = vpop.f32.mrb[26].mxu1 }
 0xc9d   : > { %v2030_v56 = vadd.f32 %v2476_v51, %v2029_v55  ;;  %v2630_v57 = vpop.f32.mrb[27].mxu1  ;;  %v2033_v58 = vadd.f32 %v2027_v53, %v1860_v18  ;;  %v2483_v18 = vld [vmem:[%s1024_s15] ss:$0 sm:$0xff]  ;;  %s4151_s15 = sld [smem:[#allocation57_spill]] }
 0xc9f   : > { %v2037_v59 = vsel %vm1106_vm2, %v2033_v58, 0.0  ;;  %v2034_v60 = vadd.f32 %v2030_v56, %v1861_v19 }
 0xca0   : > { %2038 = vadd.xlane.f32.xlu0 %v2037_v59 }
 0xca1   : > { %v2040_v61 = vsel %vm1106_vm2, %v2034_v60, 0.0 }
 0xca2   : > { %2041 = vadd.xlane.f32.xlu1 %v2040_v61 }
 0xca3   : > { %s3911_s18 = scalar_lea.hbm %s4151_s15, %s2485_s14 }
 0xd2d   : > { %v2039_v62 = vpop.xlane.xlu0 %2038 }
 0xd2e   : > { %v2043_v63 = vmul.f32 0.03125, %v2039_v62 }
 0xd2f   : > { %v2042_v34 = vpop.xlane.xlu1 %2041 }
 0xd30   : > { %v2045_v0 = vsub.f32 %v2033_v58, %v2043_v63  ;;  %v2044_v35 = vmul.f32 0.03125, %v2042_v34 }
 0xd32   : > { %v2046_v1 = vsub.f32 %v2034_v60, %v2044_v35  ;;  %v2047_v3 = vmul.f32 %v2045_v0, %v2045_v0 }
 0xd34   : > { %v2049_v4 = vsel %vm1106_vm2, %v2047_v3, 0.0  ;;  %v2048_v5 = vmul.f32 %v2046_v1, %v2046_v1 }
 0xd35   : > { %2050 = vadd.xlane.f32.xlu0 %v2049_v4 }
 0xd36   : > { %v2052_v6 = vsel %vm1106_vm2, %v2048_v5, 0.0 }
 0xd37   : > { %2053 = vadd.xlane.f32.xlu1 %v2052_v6 }
 0xdc2   : > { %v2051_v8 = vpop.xlane.xlu0 %2050 }
 0xdc3   : > { %v2055_v10 = vmul.f32 0.03125, %v2051_v8 }
 0xdc4   : > { %v2054_v9 = vpop.xlane.xlu1 %2053 }
 0xdc5   : > { %v2057_v12 = vadd.f32 1e-12, %v2055_v10  ;;  %v2056_v13 = vmul.f32 0.03125, %v2054_v9 }
 0xdc7   : > { %2819 = vrsqrt.f32 %v2057_v12  ;;  %v2058_v14 = vadd.f32 1e-12, %v2056_v13 }
 0xdc9   : > { %2821 = vrsqrt.f32 %v2058_v14 }
 0xdd1   : > { %v2820_v15 = vpop.eup %2819 }
 0xdd2   : > { %v2061_v11 = vmul.f32 %v2820_v15, %v2045_v0 }
 0xdd3   : > { %v2822_v17 = vpop.eup %2821 }
 0xdd4   : > { %v2062_v19 = vmul.f32 %v2822_v17, %v2046_v1  ;;  %v2069_v7 = vmul.f32 %v2482_v16, %v2061_v11 }
 0xdd6   : > { %v2070_v20 = vmul.f32 %v2482_v16, %v2062_v19  ;;  %v2077_v21 = vadd.f32 %v2483_v18, %v2069_v7 }
 0xdd8   : > { %v2078_v22 = vadd.f32 %v2483_v18, %v2070_v20  ;;  %2079 = vst.msk [vmem:[#allocation2] sm:$0xff] %vm1106_vm2, %v2077_v21 }
 0xdda   : > { %2080 = vst.msk [vmem:[#allocation2 + $0x8] sm:$0xff] %vm1106_vm2, %v2078_v22  ;;  %v2083_v23 = vrot.slane %v2078_v22, 7 }
 0xddc   : > { %v2085_v24 = vsel %vm2084_vm8, %v2083_v23, %v2077_v21 }
 0xddd   : > { %2088 = vst.msk [vmem:[%s3705_s6] sm:$0x3] %vm2087_vm9, %v2085_v24 }
 0xdde   : > { %3012 = shalt.err (!%p3009_p8)
}
 0xddf   : > { %s3013_s13 = scalar_lea.hbm %s3911_s18, 32  ;;  %s3017_s17 = scalar_lea.hbm %s4151_s15, 64 }
 0xde0   : > { %p3014_p9 = scmp.ne.s32.totalorder %s3911_s18, %s3013_s13  ;;  %p3018_p12 = scmp.lt.u32.totalorder %s3911_s18, %s4151_s15 }
 0xde1   : > { %p3019_p11 = scmp.lt.u32.totalorder %s3017_s17, %s3013_s13  ;;  %p3021_p0 = scmp.lt.u32.totalorder %s3013_s13, %s3911_s18 }
 0xde2   : > { %p3015_p7 = pnand %p3014_p9, %p4152_p6 }
 0xde3   : > { %p3020_p4 = por %p3019_p11, %p3018_p12 }
 0xde4   : > { %p3016_p2 = pneg %p3015_p7 }
 0xde5   : > { %p3022_p5 = por %p3021_p0, %p3020_p4 }
 0xde7   : > { %p3023_p10 = pnand %p3022_p5, %p3016_p2 }
 0xde9   : > { %3026 = shalt.err (!%p3023_p10)
}
 0xdea   : > { %2647 = dma.vmem_to_hbm [thread:$0]  (%p4152_p6), %s3913_s4, 32, %s3911_s18, %s2090_s5  }
 0xdeb PF: > { %s4153_s11 = sld [smem:[#allocation30_spill]]  ;;  %s4154_s3 = sld [smem:[#allocation23_spill]] }
 0xdec   : > { %s4155_s19 = sld [smem:[#allocation32_spill]] }
 0xdf1   : > { %p2678_p3 = scmp.ge.s32.totalorder %s4153_s11, 2  ;;  %s2115_s16 = sand.u32 1, %s4154_s3  }
 0xdf2   : > { %p4156_p13 = scmp.ne.s32.totalorder %s4155_s19, 0  ;;  %s2116_s1 = scalar_lea.sflag [#allocation6], %s2115_s16 }
 0xdf4   : > { %p2670_p1 = pnand %p2678_p3, %p4156_p13 }
 0xdf6   : > { %3088 = dma.done.wait (!%p2670_p1), %s2116_s1, 32  }
 0xdf7   : > { %3090 = vsyncadd (!%p2670_p1), %s2116_s1, 4294967264  ;;  %s43_s4 = sadd.s32 1, %s4153_s11   ;;  %s4157_s1 = sld [smem:[#allocation21_spill]] }
 0xdf8   : > { %p40_p8 = scmp.ge.s32.totalorder %s43_s4, 6   ;;  %s4158_s22 = sld [smem:[#allocation22_spill]] }
 0xdf9   : > { %s4159_s23 = sld [smem:[#allocation34_spill]]  ;;  %s4160_s24 = sld [smem:[#allocation24_spill]] }
 0xdfa   : > { %s4161_s2 = sld [smem:[#allocation25_spill]]  ;;  %s4162_s25 = sld [smem:[#allocation36_spill]] }
 0xdfb   : > { %s4163_s3 = sld [smem:[#allocation28_spill]]  ;;  %s4164_s26 = sld [smem:[#allocation29_spill]] }
 0xdfc   : > { %s4165_s27 = sld [smem:[#allocation33_spill]]  ;;  %s4166_s28 = sld [smem:[#allocation35_spill]] }
 0xdfd   :  { %42 = sbr.rel (!%p40_p8) target bundleno = 36 (0x24), region = 236 }
 0xe04   :  { %2121 = vsyncpa [#allocation5], 1 }
 0xe05   :  { %2123 = vsyncpa [#allocation5 + $0x1], 1 }
 0xe06   :  { %2124 = vsyncpa [#allocation8], 1 }
 0xe07   :  { %2125 = vsyncpa [#allocation11], 1 }
 0xe08   :  { %2127 = vsyncpa [#allocation11 + $0x1], 1 }
 0xe09   :  { %2128 = vsyncpa [#allocation14], 1 }
 0xe0a   :  { %2130 = vsyncpa [#allocation14 + $0x1], 1 }
 0xe0b   :  { %2131 = vsyncpa [#allocation6], 1 }
 0xe0c   :  { %2133 = vsyncpa [#allocation6 + $0x1], 1 }

</bundles_post_ra>
